<compile_context>
chip_gen: v7x
topology: tpu7x:2x2x1
jax: 0.10.0
libtpu: 0.0.40
codegen_flags: <defaults>
</compile_context>

<pallas_src>
import jax
import jax.numpy as jnp
from jax.experimental import pallas as pl
from jax.experimental.pallas import tpu as pltpu

LANE = 128


# ----------------------------- Pallas kernel -------------------------------

def _conv_bn_relu_kernel(a_ref, w_ref, bias_ref, o_ref):
    # a_ref:    (block_m, K)      bf16 im2col patch tile
    # w_ref:    (K, Cout_pad)     bf16 conv weights with BN scale folded in
    # bias_ref: (1, Cout_pad)     f32 folded BN bias
    # o_ref:    (block_m, Cout_pad) f32
    acc = jnp.dot(a_ref[...], w_ref[...], preferred_element_type=jnp.float32)
    o_ref[...] = jnp.maximum(acc + bias_ref[...], 0.0).astype(o_ref.dtype)


def conv_bn_relu(x_nhwc, weight, gamma, beta, mean, var, *, stride, padding,
                 eps=1e-5, block_m_max=512):
    """Fused Conv2d(stride, padding, no bias) + BN(eval) + ReLU.

    x_nhwc: (N, H, W, Cin) float32
    weight: (Cout, Cin, KH, KW)  -- PyTorch layout
    """
    N, H, W, Cin = x_nhwc.shape
    Cout, _, KH, KW = weight.shape
    Hout = (H + 2 * padding - KH) // stride + 1
    Wout = (W + 2 * padding - KW) // stride + 1

    # ---- glue: pad + im2col patch extraction in bf16 (ordering: [kh, kw, cin]) ----
    xb = x_nhwc.astype(jnp.bfloat16)
    xp = jnp.pad(xb, ((0, 0), (padding, padding), (padding, padding), (0, 0)))
    patches = []
    for kh in range(KH):
        for kw in range(KW):
            sl = xp[:, kh:kh + stride * (Hout - 1) + 1:stride,
                       kw:kw + stride * (Wout - 1) + 1:stride, :]
            patches.append(sl)
    a = jnp.concatenate(patches, axis=-1).reshape(N * Hout * Wout, KH * KW * Cin)

    K = KH * KW * Cin
    # lane-dense output: pad Cout up to a multiple of 128 lanes
    Cp = ((Cout + LANE - 1) // LANE) * LANE

    # fold BN (eval mode): scale into the weight columns, keep bias for the kernel
    inv_std = 1.0 / jnp.sqrt(var.astype(jnp.float32) + eps)
    scale = gamma.astype(jnp.float32) * inv_std                        # (Cout,)
    bias = beta.astype(jnp.float32) - mean.astype(jnp.float32) * scale  # (Cout,)

    # weight matrix with matching [kh, kw, cin] -> cout ordering; fold scale; bf16
    w_mat = jnp.transpose(weight, (2, 3, 1, 0)).reshape(K, Cout).astype(jnp.float32)
    w_mat = (w_mat * scale[None, :]).astype(jnp.bfloat16)
    w_mat = jnp.pad(w_mat, ((0, 0), (0, Cp - Cout)))
    bias_row = jnp.pad(bias.reshape(1, Cout), ((0, 0), (0, Cp - Cout)))

    # adaptive M tiling: big tiles amortize per-grid-step overhead
    M = N * Hout * Wout
    bm = min(block_m_max, M)
    bm = ((bm + 7) // 8) * 8                       # sublane-aligned tile
    M_pad = ((M + bm - 1) // bm) * bm
    if M_pad != M:
        a = jnp.pad(a, ((0, M_pad - M), (0, 0)))

    cost = pl.CostEstimate(
        flops=2 * M_pad * K * Cp,
        transcendentals=0,
        bytes_accessed=M_pad * K * 2 + K * Cp * 2 + M_pad * Cp * 4,
    )

    out = pl.pallas_call(
        _conv_bn_relu_kernel,
        out_shape=jax.ShapeDtypeStruct((M_pad, Cp), jnp.float32),
        grid=(M_pad // bm,),
        in_specs=[
            pl.BlockSpec((bm, K), lambda i: (i, 0)),
            pl.BlockSpec((K, Cp), lambda i: (0, 0)),
            pl.BlockSpec((1, Cp), lambda i: (0, 0)),
        ],
        out_specs=pl.BlockSpec((bm, Cp), lambda i: (i, 0)),
        compiler_params=pltpu.CompilerParams(
            dimension_semantics=("parallel",)),
        cost_estimate=cost,
    )(a, w_mat, bias_row)

    return out[:M, :Cout].reshape(N, Hout, Wout, Cout)


# --------------------------- parameter construction ------------------------

def _init_conv_bn(key, in_ch, out_ch, k, stride, padding):
    kw_, kg, kb, km, kv = jax.random.split(key, 5)
    return dict(
        weight=jax.random.normal(kw_, (out_ch, in_ch, k, k), jnp.float32) * 0.1,
        gamma=jax.random.uniform(kg, (out_ch,), jnp.float32, minval=0.5, maxval=1.5),
        beta=jax.random.normal(kb, (out_ch,), jnp.float32) * 0.1,
        mean=jax.random.normal(km, (out_ch,), jnp.float32) * 0.1,
        var=jax.random.uniform(kv, (out_ch,), jnp.float32, minval=0.5, maxval=1.5),
        stride=stride,
        padding=padding,
    )


class VGGNetPallas:
    """JAX/Pallas re-implementation of VGGNet's forward pass."""

    def __init__(self, stem_channels, stage_channels, block_per_stage,
                 kernel_size=3, num_out=5, key=None):
        if isinstance(kernel_size, int):
            kernel_sizes = [kernel_size] * len(stage_channels)
        else:
            assert len(kernel_size) == len(stage_channels)
            kernel_sizes = list(kernel_size)
        assert num_out <= len(stage_channels)

        key = jax.random.PRNGKey(0) if key is None else key
        keys = jax.random.split(key, 1 + sum(block_per_stage))
        kidx = 0

        self.stage_nums = len(stage_channels)
        self.start_stage = len(stage_channels) - num_out + 1
        self.last_stage = len(stage_channels)

        # stem: Conv(3 -> stem_channels, k3, s2, p1) + BN + ReLU
        self.stem = _init_conv_bn(keys[kidx], 3, stem_channels, 3, stride=2, padding=1)
        kidx += 1

        # stages
        self.stages = []
        in_channel = stem_channels
        for s in range(self.stage_nums):
            k = kernel_sizes[s]
            pad = k // 2
            blocks = []
            for num in range(block_per_stage[s]):
                if num == 0:
                    blocks.append(_init_conv_bn(keys[kidx], in_channel,
                                                stage_channels[s], k,
                                                stride=2, padding=pad))
                else:
                    blocks.append(_init_conv_bn(keys[kidx], stage_channels[s],
                                                stage_channels[s], k,
                                                stride=1, padding=pad))
                kidx += 1
            in_channel = stage_channels[s]
            self.stages.append(blocks)

        # jit the whole forward: weight transposes / BN folds become compile-time consts
        self._forward = jax.jit(self._forward_impl)

    @staticmethod
    def _apply_layer(x, p):
        return conv_bn_relu(x, p["weight"], p["gamma"], p["beta"], p["mean"],
                            p["var"], stride=p["stride"], padding=p["padding"])

    def _apply_stage(self, x, blocks):
        for p in blocks:
            x = self._apply_layer(x, p)
        return x

    def _forward_impl(self, x_nchw):
        # NCHW (PyTorch) -> NHWC (kernel layout)
        x = jnp.transpose(x_nchw, (0, 2, 3, 1)).astype(jnp.float32)
        x = self._apply_layer(x, self.stem)
        for i in range(self.start_stage):
            x = self._apply_stage(x, self.stages[i])
        out = []
        for i in range(self.start_stage, len(self.stages)):
            out.append(x)
            x = self._apply_stage(x, self.stages[i])
        out.append(x)
        # back to NCHW to match PyTorch output convention
        return [jnp.transpose(o, (0, 3, 1, 2)) for o in out]

    def __call__(self, x_nchw):
        return self._forward(x_nchw)


# --------------------------------- main -------------------------------------

if __name__ == "__main__":
    # Small deterministic config:
    #   stem=8, stages=[8, 16, 32, 32], blocks=[1, 2, 1, 1], num_out=2
    # Input 2x3x64x64 -> outputs [2x32x4x4, 2x32x2x2]
    model = VGGNetPallas(
        stem_channels=8,
        stage_channels=[8, 16, 32, 32],
        block_per_stage=[1, 2, 1, 1],
        kernel_size=3,
        num_out=2,
        key=jax.random.PRNGKey(0),
    )

    x = jax.random.normal(jax.random.PRNGKey(1), (2, 3, 64, 64), jnp.float32)
    outs = model(x)
    for o in outs:
        jax.block_until_ready(o)

    expected = [(2, 32, 4, 4), (2, 32, 2, 2)]
    assert [tuple(o.shape) for o in outs] == expected, [o.shape for o in outs]
    assert all(bool(jnp.all(jnp.isfinite(o))) for o in outs)
    print("KERNEL_OK")
</pallas_src>

<mosaic_0001>
module attributes {stable_mosaic.version = 11 : i64} {
  func.func @_conv_bn_relu_kernel(%arg0: i32, %arg1: memref<512x27xbf16, #tpu.memory_space<vmem>>, %arg2: memref<27x128xbf16, #tpu.memory_space<vmem>>, %arg3: memref<1x128xf32, #tpu.memory_space<vmem>>, %arg4: memref<512x128xf32, #tpu.memory_space<vmem>>) attributes {dimension_semantics = [#tpu.dimension_semantics<parallel>], iteration_bounds = array<i64: 4>, scalar_prefetch = 0 : i64, scratch_operands = 0 : i64, tpu.core_type = #tpu.core_type<tc>, window_params = [{transform_indices = @transform_0, window_bounds = array<i64: 512, 27>}, {pipeline_mode = #tpu.pipeline_mode<synchronous>, transform_indices = @transform_1, window_bounds = array<i64: 27, 128>}, {pipeline_mode = #tpu.pipeline_mode<synchronous>, transform_indices = @transform_2, window_bounds = array<i64: 1, 128>}, {transform_indices = @transform_3, window_bounds = array<i64: 512, 128>}]} {
    %c0 = arith.constant 0 : index
    %c0_0 = arith.constant 0 : index
    %0 = vector.load %arg1[%c0, %c0_0] : memref<512x27xbf16, #tpu.memory_space<vmem>>, vector<512x27xbf16>
    %c0_1 = arith.constant 0 : index
    %c0_2 = arith.constant 0 : index
    %1 = vector.load %arg2[%c0_1, %c0_2] : memref<27x128xbf16, #tpu.memory_space<vmem>>, vector<27x128xbf16>
    %cst = arith.constant dense<0.000000e+00> : vector<512x128xf32>
    %2 = tpu.matmul %0, %1, %cst {dimension_numbers = #tpu.dot_dimension_numbers<[1], [0], [0], [1], [0, 0, 1, 1], [], []>} : vector<512x27xbf16>, vector<27x128xbf16>, vector<512x128xf32> -> vector<512x128xf32>
    %c0_3 = arith.constant 0 : index
    %c0_4 = arith.constant 0 : index
    %3 = vector.load %arg3[%c0_3, %c0_4] : memref<1x128xf32, #tpu.memory_space<vmem>>, vector<1x128xf32>
    %4 = vector.broadcast %3 : vector<1x128xf32> to vector<512x128xf32>
    %5 = arith.addf %2, %4 : vector<512x128xf32>
    %cst_5 = arith.constant 0.000000e+00 : f32
    %6 = vector.broadcast %cst_5 : f32 to vector<512x128xf32>
    %7 = arith.maximumf %5, %6 : vector<512x128xf32>
    %c0_6 = arith.constant 0 : index
    %c0_7 = arith.constant 0 : index
    %8 = vector.load %arg4[%c0_6, %c0_7] : memref<512x128xf32, #tpu.memory_space<vmem>>, vector<512x128xf32>
    tpu.vector_store %arg4[%c0_6, %c0_7], %7 {strides = array<i32>} : memref<512x128xf32, #tpu.memory_space<vmem>>, vector<512x128xf32>,
    return
  }
  func.func @transform_0(%arg0: i32) -> (i32, i32) {
    %c0_i32 = arith.constant 0 : i32
    %c0_i32_0 = arith.constant 0 : i32
    return %arg0, %c0_i32 : i32, i32
  }
  func.func @transform_1(%arg0: i32) -> (i32, i32) {
    %c0_i32 = arith.constant 0 : i32
    %c0_i32_0 = arith.constant 0 : i32
    %c0_i32_1 = arith.constant 0 : i32
    return %c0_i32, %c0_i32_0 : i32, i32
  }
  func.func @transform_2(%arg0: i32) -> (i32, i32) {
    %c0_i32 = arith.constant 0 : i32
    %c0_i32_0 = arith.constant 0 : i32
    %c0_i32_1 = arith.constant 0 : i32
    return %c0_i32, %c0_i32_0 : i32, i32
  }
  func.func @transform_3(%arg0: i32) -> (i32, i32) {
    %c0_i32 = arith.constant 0 : i32
    %c0_i32_0 = arith.constant 0 : i32
    return %arg0, %c0_i32 : i32, i32
  }
}

module attributes {stable_mosaic.version = 11 : i64} {
  func.func @_conv_bn_relu_kernel(%arg0: i32, %arg1: memref<512x72xbf16, #tpu.memory_space<vmem>>, %arg2: memref<72x128xbf16, #tpu.memory_space<vmem>>, %arg3: memref<1x128xf32, #tpu.memory_space<vmem>>, %arg4: memref<512x128xf32, #tpu.memory_space<vmem>>) attributes {dimension_semantics = [#tpu.dimension_semantics<parallel>], iteration_bounds = array<i64: 1>, scalar_prefetch = 0 : i64, scratch_operands = 0 : i64, tpu.core_type = #tpu.core_type<tc>, window_params = [{transform_indices = @transform_0, window_bounds = array<i64: 512, 72>}, {pipeline_mode = #tpu.pipeline_mode<synchronous>, transform_indices = @transform_1, window_bounds = array<i64: 72, 128>}, {pipeline_mode = #tpu.pipeline_mode<synchronous>, transform_indices = @transform_2, window_bounds = array<i64: 1, 128>}, {transform_indices = @transform_3, window_bounds = array<i64: 512, 128>}]} {
    %c0 = arith.constant 0 : index
    %c0_0 = arith.constant 0 : index
    %0 = vector.load %arg1[%c0, %c0_0] : memref<512x72xbf16, #tpu.memory_space<vmem>>, vector<512x72xbf16>
    %c0_1 = arith.constant 0 : index
    %c0_2 = arith.constant 0 : index
    %1 = vector.load %arg2[%c0_1, %c0_2] : memref<72x128xbf16, #tpu.memory_space<vmem>>, vector<72x128xbf16>
    %cst = arith.constant dense<0.000000e+00> : vector<512x128xf32>
    %2 = tpu.matmul %0, %1, %cst {dimension_numbers = #tpu.dot_dimension_numbers<[1], [0], [0], [1], [0, 0, 1, 1], [], []>} : vector<512x72xbf16>, vector<72x128xbf16>, vector<512x128xf32> -> vector<512x128xf32>
    %c0_3 = arith.constant 0 : index
    %c0_4 = arith.constant 0 : index
    %3 = vector.load %arg3[%c0_3, %c0_4] : memref<1x128xf32, #tpu.memory_space<vmem>>, vector<1x128xf32>
    %4 = vector.broadcast %3 : vector<1x128xf32> to vector<512x128xf32>
    %5 = arith.addf %2, %4 : vector<512x128xf32>
    %cst_5 = arith.constant 0.000000e+00 : f32
    %6 = vector.broadcast %cst_5 : f32 to vector<512x128xf32>
    %7 = arith.maximumf %5, %6 : vector<512x128xf32>
    %c0_6 = arith.constant 0 : index
    %c0_7 = arith.constant 0 : index
    %8 = vector.load %arg4[%c0_6, %c0_7] : memref<512x128xf32, #tpu.memory_space<vmem>>, vector<512x128xf32>
    tpu.vector_store %arg4[%c0_6, %c0_7], %7 {strides = array<i32>} : memref<512x128xf32, #tpu.memory_space<vmem>>, vector<512x128xf32>,
    return
  }
  func.func @transform_0(%arg0: i32) -> (i32, i32) {
    %c0_i32 = arith.constant 0 : i32
    %c0_i32_0 = arith.constant 0 : i32
    return %arg0, %c0_i32 : i32, i32
  }
  func.func @transform_1(%arg0: i32) -> (i32, i32) {
    %c0_i32 = arith.constant 0 : i32
    %c0_i32_0 = arith.constant 0 : i32
    %c0_i32_1 = arith.constant 0 : i32
    return %c0_i32, %c0_i32_0 : i32, i32
  }
  func.func @transform_2(%arg0: i32) -> (i32, i32) {
    %c0_i32 = arith.constant 0 : i32
    %c0_i32_0 = arith.constant 0 : i32
    %c0_i32_1 = arith.constant 0 : i32
    return %c0_i32, %c0_i32_0 : i32, i32
  }
  func.func @transform_3(%arg0: i32) -> (i32, i32) {
    %c0_i32 = arith.constant 0 : i32
    %c0_i32_0 = arith.constant 0 : i32
    return %arg0, %c0_i32 : i32, i32
  }
}

module attributes {stable_mosaic.version = 11 : i64} {
  func.func @_conv_bn_relu_kernel(%arg0: i32, %arg1: memref<128x72xbf16, #tpu.memory_space<vmem>>, %arg2: memref<72x128xbf16, #tpu.memory_space<vmem>>, %arg3: memref<1x128xf32, #tpu.memory_space<vmem>>, %arg4: memref<128x128xf32, #tpu.memory_space<vmem>>) attributes {dimension_semantics = [#tpu.dimension_semantics<parallel>], iteration_bounds = array<i64: 1>, scalar_prefetch = 0 : i64, scratch_operands = 0 : i64, tpu.core_type = #tpu.core_type<tc>, window_params = [{transform_indices = @transform_0, window_bounds = array<i64: 128, 72>}, {pipeline_mode = #tpu.pipeline_mode<synchronous>, transform_indices = @transform_1, window_bounds = array<i64: 72, 128>}, {pipeline_mode = #tpu.pipeline_mode<synchronous>, transform_indices = @transform_2, window_bounds = array<i64: 1, 128>}, {transform_indices = @transform_3, window_bounds = array<i64: 128, 128>}]} {
    %c0 = arith.constant 0 : index
    %c0_0 = arith.constant 0 : index
    %0 = vector.load %arg1[%c0, %c0_0] : memref<128x72xbf16, #tpu.memory_space<vmem>>, vector<128x72xbf16>
    %c0_1 = arith.constant 0 : index
    %c0_2 = arith.constant 0 : index
    %1 = vector.load %arg2[%c0_1, %c0_2] : memref<72x128xbf16, #tpu.memory_space<vmem>>, vector<72x128xbf16>
    %cst = arith.constant dense<0.000000e+00> : vector<128x128xf32>
    %2 = tpu.matmul %0, %1, %cst {dimension_numbers = #tpu.dot_dimension_numbers<[1], [0], [0], [1], [0, 0, 1, 1], [], []>} : vector<128x72xbf16>, vector<72x128xbf16>, vector<128x128xf32> -> vector<128x128xf32>
    %c0_3 = arith.constant 0 : index
    %c0_4 = arith.constant 0 : index
    %3 = vector.load %arg3[%c0_3, %c0_4] : memref<1x128xf32, #tpu.memory_space<vmem>>, vector<1x128xf32>
    %4 = vector.broadcast %3 : vector<1x128xf32> to vector<128x128xf32>
    %5 = arith.addf %2, %4 : vector<128x128xf32>
    %cst_5 = arith.constant 0.000000e+00 : f32
    %6 = vector.broadcast %cst_5 : f32 to vector<128x128xf32>
    %7 = arith.maximumf %5, %6 : vector<128x128xf32>
    %c0_6 = arith.constant 0 : index
    %c0_7 = arith.constant 0 : index
    %8 = vector.load %arg4[%c0_6, %c0_7] : memref<128x128xf32, #tpu.memory_space<vmem>>, vector<128x128xf32>
    tpu.vector_store %arg4[%c0_6, %c0_7], %7 {strides = array<i32>} : memref<128x128xf32, #tpu.memory_space<vmem>>, vector<128x128xf32>,
    return
  }
  func.func @transform_0(%arg0: i32) -> (i32, i32) {
    %c0_i32 = arith.constant 0 : i32
    %c0_i32_0 = arith.constant 0 : i32
    return %arg0, %c0_i32 : i32, i32
  }
  func.func @transform_1(%arg0: i32) -> (i32, i32) {
    %c0_i32 = arith.constant 0 : i32
    %c0_i32_0 = arith.constant 0 : i32
    %c0_i32_1 = arith.constant 0 : i32
    return %c0_i32, %c0_i32_0 : i32, i32
  }
  func.func @transform_2(%arg0: i32) -> (i32, i32) {
    %c0_i32 = arith.constant 0 : i32
    %c0_i32_0 = arith.constant 0 : i32
    %c0_i32_1 = arith.constant 0 : i32
    return %c0_i32, %c0_i32_0 : i32, i32
  }
  func.func @transform_3(%arg0: i32) -> (i32, i32) {
    %c0_i32 = arith.constant 0 : i32
    %c0_i32_0 = arith.constant 0 : i32
    return %arg0, %c0_i32 : i32, i32
  }
}

module attributes {stable_mosaic.version = 11 : i64} {
  func.func @_conv_bn_relu_kernel(%arg0: i32, %arg1: memref<128x144xbf16, #tpu.memory_space<vmem>>, %arg2: memref<144x128xbf16, #tpu.memory_space<vmem>>, %arg3: memref<1x128xf32, #tpu.memory_space<vmem>>, %arg4: memref<128x128xf32, #tpu.memory_space<vmem>>) attributes {dimension_semantics = [#tpu.dimension_semantics<parallel>], iteration_bounds = array<i64: 1>, scalar_prefetch = 0 : i64, scratch_operands = 0 : i64, tpu.core_type = #tpu.core_type<tc>, window_params = [{transform_indices = @transform_0, window_bounds = array<i64: 128, 144>}, {pipeline_mode = #tpu.pipeline_mode<synchronous>, transform_indices = @transform_1, window_bounds = array<i64: 144, 128>}, {pipeline_mode = #tpu.pipeline_mode<synchronous>, transform_indices = @transform_2, window_bounds = array<i64: 1, 128>}, {transform_indices = @transform_3, window_bounds = array<i64: 128, 128>}]} {
    %c0 = arith.constant 0 : index
    %c0_0 = arith.constant 0 : index
    %0 = vector.load %arg1[%c0, %c0_0] : memref<128x144xbf16, #tpu.memory_space<vmem>>, vector<128x144xbf16>
    %c0_1 = arith.constant 0 : index
    %c0_2 = arith.constant 0 : index
    %1 = vector.load %arg2[%c0_1, %c0_2] : memref<144x128xbf16, #tpu.memory_space<vmem>>, vector<144x128xbf16>
    %cst = arith.constant dense<0.000000e+00> : vector<128x128xf32>
    %2 = tpu.matmul %0, %1, %cst {dimension_numbers = #tpu.dot_dimension_numbers<[1], [0], [0], [1], [0, 0, 1, 1], [], []>} : vector<128x144xbf16>, vector<144x128xbf16>, vector<128x128xf32> -> vector<128x128xf32>
    %c0_3 = arith.constant 0 : index
    %c0_4 = arith.constant 0 : index
    %3 = vector.load %arg3[%c0_3, %c0_4] : memref<1x128xf32, #tpu.memory_space<vmem>>, vector<1x128xf32>
    %4 = vector.broadcast %3 : vector<1x128xf32> to vector<128x128xf32>
    %5 = arith.addf %2, %4 : vector<128x128xf32>
    %cst_5 = arith.constant 0.000000e+00 : f32
    %6 = vector.broadcast %cst_5 : f32 to vector<128x128xf32>
    %7 = arith.maximumf %5, %6 : vector<128x128xf32>
    %c0_6 = arith.constant 0 : index
    %c0_7 = arith.constant 0 : index
    %8 = vector.load %arg4[%c0_6, %c0_7] : memref<128x128xf32, #tpu.memory_space<vmem>>, vector<128x128xf32>
    tpu.vector_store %arg4[%c0_6, %c0_7], %7 {strides = array<i32>} : memref<128x128xf32, #tpu.memory_space<vmem>>, vector<128x128xf32>,
    return
  }
  func.func @transform_0(%arg0: i32) -> (i32, i32) {
    %c0_i32 = arith.constant 0 : i32
    %c0_i32_0 = arith.constant 0 : i32
    return %arg0, %c0_i32 : i32, i32
  }
  func.func @transform_1(%arg0: i32) -> (i32, i32) {
    %c0_i32 = arith.constant 0 : i32
    %c0_i32_0 = arith.constant 0 : i32
    %c0_i32_1 = arith.constant 0 : i32
    return %c0_i32, %c0_i32_0 : i32, i32
  }
  func.func @transform_2(%arg0: i32) -> (i32, i32) {
    %c0_i32 = arith.constant 0 : i32
    %c0_i32_0 = arith.constant 0 : i32
    %c0_i32_1 = arith.constant 0 : i32
    return %c0_i32, %c0_i32_0 : i32, i32
  }
  func.func @transform_3(%arg0: i32) -> (i32, i32) {
    %c0_i32 = arith.constant 0 : i32
    %c0_i32_0 = arith.constant 0 : i32
    return %arg0, %c0_i32 : i32, i32
  }
}

module attributes {stable_mosaic.version = 11 : i64} {
  func.func @_conv_bn_relu_kernel(%arg0: i32, %arg1: memref<32x144xbf16, #tpu.memory_space<vmem>>, %arg2: memref<144x128xbf16, #tpu.memory_space<vmem>>, %arg3: memref<1x128xf32, #tpu.memory_space<vmem>>, %arg4: memref<32x128xf32, #tpu.memory_space<vmem>>) attributes {dimension_semantics = [#tpu.dimension_semantics<parallel>], iteration_bounds = array<i64: 1>, scalar_prefetch = 0 : i64, scratch_operands = 0 : i64, tpu.core_type = #tpu.core_type<tc>, window_params = [{transform_indices = @transform_0, window_bounds = array<i64: 32, 144>}, {pipeline_mode = #tpu.pipeline_mode<synchronous>, transform_indices = @transform_1, window_bounds = array<i64: 144, 128>}, {pipeline_mode = #tpu.pipeline_mode<synchronous>, transform_indices = @transform_2, window_bounds = array<i64: 1, 128>}, {transform_indices = @transform_3, window_bounds = array<i64: 32, 128>}]} {
    %c0 = arith.constant 0 : index
    %c0_0 = arith.constant 0 : index
    %0 = vector.load %arg1[%c0, %c0_0] : memref<32x144xbf16, #tpu.memory_space<vmem>>, vector<32x144xbf16>
    %c0_1 = arith.constant 0 : index
    %c0_2 = arith.constant 0 : index
    %1 = vector.load %arg2[%c0_1, %c0_2] : memref<144x128xbf16, #tpu.memory_space<vmem>>, vector<144x128xbf16>
    %cst = arith.constant dense<0.000000e+00> : vector<32x128xf32>
    %2 = tpu.matmul %0, %1, %cst {dimension_numbers = #tpu.dot_dimension_numbers<[1], [0], [0], [1], [0, 0, 1, 1], [], []>} : vector<32x144xbf16>, vector<144x128xbf16>, vector<32x128xf32> -> vector<32x128xf32>
    %c0_3 = arith.constant 0 : index
    %c0_4 = arith.constant 0 : index
    %3 = vector.load %arg3[%c0_3, %c0_4] : memref<1x128xf32, #tpu.memory_space<vmem>>, vector<1x128xf32>
    %4 = vector.broadcast %3 : vector<1x128xf32> to vector<32x128xf32>
    %5 = arith.addf %2, %4 : vector<32x128xf32>
    %cst_5 = arith.constant 0.000000e+00 : f32
    %6 = vector.broadcast %cst_5 : f32 to vector<32x128xf32>
    %7 = arith.maximumf %5, %6 : vector<32x128xf32>
    %c0_6 = arith.constant 0 : index
    %c0_7 = arith.constant 0 : index
    %8 = vector.load %arg4[%c0_6, %c0_7] : memref<32x128xf32, #tpu.memory_space<vmem>>, vector<32x128xf32>
    tpu.vector_store %arg4[%c0_6, %c0_7], %7 {strides = array<i32>} : memref<32x128xf32, #tpu.memory_space<vmem>>, vector<32x128xf32>,
    return
  }
  func.func @transform_0(%arg0: i32) -> (i32, i32) {
    %c0_i32 = arith.constant 0 : i32
    %c0_i32_0 = arith.constant 0 : i32
    return %arg0, %c0_i32 : i32, i32
  }
  func.func @transform_1(%arg0: i32) -> (i32, i32) {
    %c0_i32 = arith.constant 0 : i32
    %c0_i32_0 = arith.constant 0 : i32
    %c0_i32_1 = arith.constant 0 : i32
    return %c0_i32, %c0_i32_0 : i32, i32
  }
  func.func @transform_2(%arg0: i32) -> (i32, i32) {
    %c0_i32 = arith.constant 0 : i32
    %c0_i32_0 = arith.constant 0 : i32
    %c0_i32_1 = arith.constant 0 : i32
    return %c0_i32, %c0_i32_0 : i32, i32
  }
  func.func @transform_3(%arg0: i32) -> (i32, i32) {
    %c0_i32 = arith.constant 0 : i32
    %c0_i32_0 = arith.constant 0 : i32
    return %arg0, %c0_i32 : i32, i32
  }
}

module attributes {stable_mosaic.version = 11 : i64} {
  func.func @_conv_bn_relu_kernel(%arg0: i32, %arg1: memref<8x288xbf16, #tpu.memory_space<vmem>>, %arg2: memref<288x128xbf16, #tpu.memory_space<vmem>>, %arg3: memref<1x128xf32, #tpu.memory_space<vmem>>, %arg4: memref<8x128xf32, #tpu.memory_space<vmem>>) attributes {dimension_semantics = [#tpu.dimension_semantics<parallel>], iteration_bounds = array<i64: 1>, scalar_prefetch = 0 : i64, scratch_operands = 0 : i64, tpu.core_type = #tpu.core_type<tc>, window_params = [{transform_indices = @transform_0, window_bounds = array<i64: 8, 288>}, {pipeline_mode = #tpu.pipeline_mode<synchronous>, transform_indices = @transform_1, window_bounds = array<i64: 288, 128>}, {pipeline_mode = #tpu.pipeline_mode<synchronous>, transform_indices = @transform_2, window_bounds = array<i64: 1, 128>}, {transform_indices = @transform_3, window_bounds = array<i64: 8, 128>}]} {
    %c0 = arith.constant 0 : index
    %c0_0 = arith.constant 0 : index
    %0 = vector.load %arg1[%c0, %c0_0] : memref<8x288xbf16, #tpu.memory_space<vmem>>, vector<8x288xbf16>
    %c0_1 = arith.constant 0 : index
    %c0_2 = arith.constant 0 : index
    %1 = vector.load %arg2[%c0_1, %c0_2] : memref<288x128xbf16, #tpu.memory_space<vmem>>, vector<288x128xbf16>
    %cst = arith.constant dense<0.000000e+00> : vector<8x128xf32>
    %2 = tpu.matmul %0, %1, %cst {dimension_numbers = #tpu.dot_dimension_numbers<[1], [0], [0], [1], [0, 0, 1, 1], [], []>} : vector<8x288xbf16>, vector<288x128xbf16>, vector<8x128xf32> -> vector<8x128xf32>
    %c0_3 = arith.constant 0 : index
    %c0_4 = arith.constant 0 : index
    %3 = vector.load %arg3[%c0_3, %c0_4] : memref<1x128xf32, #tpu.memory_space<vmem>>, vector<1x128xf32>
    %4 = vector.broadcast %3 : vector<1x128xf32> to vector<8x128xf32>
    %5 = arith.addf %2, %4 : vector<8x128xf32>
    %cst_5 = arith.constant 0.000000e+00 : f32
    %6 = vector.broadcast %cst_5 : f32 to vector<8x128xf32>
    %7 = arith.maximumf %5, %6 : vector<8x128xf32>
    %c0_6 = arith.constant 0 : index
    %c0_7 = arith.constant 0 : index
    %8 = vector.load %arg4[%c0_6, %c0_7] : memref<8x128xf32, #tpu.memory_space<vmem>>, vector<8x128xf32>
    tpu.vector_store %arg4[%c0_6, %c0_7], %7 {strides = array<i32>} : memref<8x128xf32, #tpu.memory_space<vmem>>, vector<8x128xf32>,
    return
  }
  func.func @transform_0(%arg0: i32) -> (i32, i32) {
    %c0_i32 = arith.constant 0 : i32
    %c0_i32_0 = arith.constant 0 : i32
    return %arg0, %c0_i32 : i32, i32
  }
  func.func @transform_1(%arg0: i32) -> (i32, i32) {
    %c0_i32 = arith.constant 0 : i32
    %c0_i32_0 = arith.constant 0 : i32
    %c0_i32_1 = arith.constant 0 : i32
    return %c0_i32, %c0_i32_0 : i32, i32
  }
  func.func @transform_2(%arg0: i32) -> (i32, i32) {
    %c0_i32 = arith.constant 0 : i32
    %c0_i32_0 = arith.constant 0 : i32
    %c0_i32_1 = arith.constant 0 : i32
    return %c0_i32, %c0_i32_0 : i32, i32
  }
  func.func @transform_3(%arg0: i32) -> (i32, i32) {
    %c0_i32 = arith.constant 0 : i32
    %c0_i32_0 = arith.constant 0 : i32
    return %arg0, %c0_i32 : i32, i32
  }
}

</mosaic_0001>

<bundles_post_ra>
// kernel: _forward_impl.6
= control target key start
LH: loop header
LB: loop body
LE: loop exit
PB: predicated region body
PF: predicated region fallthrough
CT: control target
= control target key end

     0   :  { %s1254_s12 = smov 0   ;;  %s1482_s0 = inlined_call_operand.vmem [shape: bf16[2048,27], index: 0, kind: input, shape index: {}]   ;;  %s1483_s1 = inlined_call_operand.vmem [shape: bf16[27,128], index: 1, kind: input, shape index: {}]   ;;  %s1484_s2 = inlined_call_operand.vmem [shape: f32[1,128], index: 2, kind: input, shape index: {}]   ;;  %s1485_s3 = inlined_call_operand.vmem [shape: f32[2048,128], index: 3, kind: output, shape index: {}]  }
   0x1 LB: > { %s998_s13 = sadd.s32 4294967295, %s1231_s12   ;;  %p1002_p0 = scmp.ge.s32.totalorder %s1231_s12, 1  ;;  %s1231_s12 = sphi %s1254_s12, %s13_s12  }
   0x2   : > { %p138_p1 = scmp.lt.s32.totalorder %s1231_s12, 5 }
   0x4   : > { %p139_p2 = pnand %p1002_p0, %p138_p1 }
   0x5   : > { %v1191_v0 = vld [vmem:[%s1483_s1] sm:$0xff] (!%p139_p2)   ;;  %vm518_vm0 = vcmask (!%p139_p2), 1044480   ;;  %v1192_v1 = vld [vmem:[%s1483_s1 + $0x8] sm:$0x3f] (!%p139_p2)   ;;  %vm519_vm1 = vcmask (!%p139_p2), 1045504   ;;  %s1003_s18 = sshll.u32 (!%p139_p2), %s998_s13, 6 }
   0x6   : > { %142 = sbr.rel (%p139_p2) target bundleno = 295 (0x127), region = 32  ;;  %1110 = vmatprep.subr.bf16.mxu0 (!%p139_p2), %v1191_v0  ;;  %1178 = vmatprep.subr.bf16.mxu1 (!%p139_p2), %v1191_v0  ;;  %v1233_v2 = vmov (!%p139_p2), 65535   ;;  %p163_p3 = scmp.lt.s32.totalorder (!%p139_p2), %s1003_s18, 255  ;;  %vm421_vm2 = vcmask (!%p139_p2), 220160   ;;  %v1343_v38 = vld [vmem:[%s1484_s2] ss:$0 sm:$0xff] (!%p139_p2) }
   0x7   : > { %1111 = vmatpush3.bf16.msra.mxu0 (!%p139_p2), %v1191_v0  ;;  %1180 = vmatpush3.bf16.msra.mxu1 (!%p139_p2), %v1191_v0  ;;  %v520_v3 = vsel (!%p139_p2), %vm518_vm0, 4294967295, %v1233_v2 }
   0x8   : > { %v521_v4 = vsel (!%p139_p2), %vm519_vm1, %v520_v3, 0 }
   0x9   : > { %v523_v5 = vand.u32 (!%p139_p2), %v1192_v1, %v521_v4 }
   0xb   : > { %1112 = vmatprep.subr.bf16.mxu0 (!%p139_p2), %v523_v5  ;;  %1179 = vmatprep.subr.bf16.mxu1 (!%p139_p2), %v523_v5 }
   0xc   : > { %1113 = vmatpush3.bf16.msra.mxu0 (!%p139_p2), %v523_v5  ;;  %1181 = vmatpush3.bf16.msra.mxu1 (!%p139_p2), %v523_v5 }
   0xd   : > { %s1487_s18 = smov (!%p163_p3, %s1003_s18), 255 }
   0xe   : > { %s1004_s19 = sshll.u32 %s1487_s18, 2  ;;  %s1006_s25 = sshll.u32 %s1487_s18, 3 }
   0xf   : > { %s1274_s22 = scalar_lea.vmem %s1482_s0, %s1004_s19  ;;  %s1350_s28 = scalar_lea.vmem %s1485_s3, %s1006_s25 }
  0x10   : > { %v1193_v6 = vld [vmem:[%s1274_s22] sm:$0xff]   ;;  %v1195_v8 = vld [vmem:[%s1274_s22 + $0x8] sm:$0xff]   ;;  %v1197_v10 = vld [vmem:[%s1274_s22 + $0x10] sm:$0xff]  }
  0x11   : > { %v1194_v7 = vld [vmem:[%s1274_s22 + $0x80] sm:$0xff]   ;;  %1114 = vmatprep.mubr.msk.bf16.mxu0 %vm421_vm2, %v1193_v6  ;;  %v1196_v9 = vld [vmem:[%s1274_s22 + $0x88] sm:$0xff]   ;;  %v1198_v11 = vld [vmem:[%s1274_s22 + $0x90] sm:$0xff]  }
  0x12   : > { %1146 = vmatprep.mubr.msk.bf16.mxu1 %vm421_vm2, %v1194_v7  ;;  %1115 = vmatmul.mubr.msk.bf16.vlgmr.msra.gmra.mrb[0].mxu0 %vm421_vm2, %v1195_v8  ;;  %v1199_v12 = vld [vmem:[%s1274_s22 + $0x18] sm:$0xff]   ;;  %v1201_v14 = vld [vmem:[%s1274_s22 + $0x20] sm:$0xff]   ;;  %v1203_v16 = vld [vmem:[%s1274_s22 + $0x28] sm:$0xff]  }
  0x13   : > { %1147 = vmatmul.mubr.msk.bf16.vlgmr.msra.gmra.mrb[0].mxu1 %vm421_vm2, %v1196_v9  ;;  %1118 = vmatprep.mubr.msk.bf16.mxu0 %vm421_vm2, %v1197_v10  ;;  %v1200_v13 = vld [vmem:[%s1274_s22 + $0x98] sm:$0xff]   ;;  %v1202_v15 = vld [vmem:[%s1274_s22 + $0xa0] sm:$0xff]   ;;  %v1204_v17 = vld [vmem:[%s1274_s22 + $0xa8] sm:$0xff]  }
  0x14   : > { %1150 = vmatprep.mubr.msk.bf16.mxu1 %vm421_vm2, %v1198_v11  ;;  %v1205_v18 = vld [vmem:[%s1274_s22 + $0x30] sm:$0xff]   ;;  %v1207_v20 = vld [vmem:[%s1274_s22 + $0x38] sm:$0xff]   ;;  %v1209_v22 = vld [vmem:[%s1274_s22 + $0x40] sm:$0xff]  }
  0x15   : > { %v1206_v19 = vld [vmem:[%s1274_s22 + $0xb0] sm:$0xff]   ;;  %v1208_v21 = vld [vmem:[%s1274_s22 + $0xb8] sm:$0xff]   ;;  %v1210_v23 = vld [vmem:[%s1274_s22 + $0xc0] sm:$0xff]  }
  0x16   : > { %v1211_v24 = vld [vmem:[%s1274_s22 + $0x48] sm:$0xff]   ;;  %v1213_v26 = vld [vmem:[%s1274_s22 + $0x50] sm:$0xff]   ;;  %v1215_v28 = vld [vmem:[%s1274_s22 + $0x58] sm:$0xff]  }
  0x17   : > { %v1212_v25 = vld [vmem:[%s1274_s22 + $0xc8] sm:$0xff]   ;;  %v1214_v27 = vld [vmem:[%s1274_s22 + $0xd0] sm:$0xff]   ;;  %v1216_v29 = vld [vmem:[%s1274_s22 + $0xd8] sm:$0xff]  }
  0x18   : > { %v1217_v30 = vld [vmem:[%s1274_s22 + $0x60] sm:$0xff]   ;;  %v1219_v32 = vld [vmem:[%s1274_s22 + $0x68] sm:$0xff]   ;;  %v1221_v34 = vld [vmem:[%s1274_s22 + $0x70] sm:$0xff]  }
  0x19   : > { %v1218_v31 = vld [vmem:[%s1274_s22 + $0xe0] sm:$0xff]   ;;  %v1220_v33 = vld [vmem:[%s1274_s22 + $0xe8] sm:$0xff]   ;;  %v1222_v35 = vld [vmem:[%s1274_s22 + $0xf0] sm:$0xff]  }
  0x1a   : > { %1119 = vmatmul.mubr.msk.bf16.gmra.mrb[4].mxu0 %vm421_vm2, %v1199_v12  ;;  %v1223_v36 = vld [vmem:[%s1274_s22 + $0x78] sm:$0xff]  }
  0x1b   : > { %1151 = vmatmul.mubr.msk.bf16.gmra.mrb[4].mxu1 %vm421_vm2, %v1200_v13  ;;  %1122 = vmatprep.mubr.msk.bf16.mxu0 %vm421_vm2, %v1201_v14  ;;  %v1224_v37 = vld [vmem:[%s1274_s22 + $0xf8] sm:$0xff]  }
  0x1c   : > { %1154 = vmatprep.mubr.msk.bf16.mxu1 %vm421_vm2, %v1202_v15 }
  0x22   : > { %1123 = vmatmul.mubr.msk.bf16.gmra.mrb[8].mxu0 %vm421_vm2, %v1203_v16 }
  0x23   : > { %1155 = vmatmul.mubr.msk.bf16.gmra.mrb[8].mxu1 %vm421_vm2, %v1204_v17  ;;  %1126 = vmatprep.mubr.msk.bf16.mxu0 %vm421_vm2, %v1205_v18 }
  0x24   : > { %1158 = vmatprep.mubr.msk.bf16.mxu1 %vm421_vm2, %v1206_v19 }
  0x2a   : > { %1127 = vmatmul.mubr.msk.bf16.gmra.mrb[12].mxu0 %vm421_vm2, %v1207_v20 }
  0x2b   : > { %1159 = vmatmul.mubr.msk.bf16.gmra.mrb[12].mxu1 %vm421_vm2, %v1208_v21  ;;  %1130 = vmatprep.mubr.msk.bf16.mxu0 %vm421_vm2, %v1209_v22 }
  0x2c   : > { %1162 = vmatprep.mubr.msk.bf16.mxu1 %vm421_vm2, %v1210_v23 }
  0x32   : > { %1131 = vmatmul.mubr.msk.bf16.gmra.mrb[16].mxu0 %vm421_vm2, %v1211_v24 }
  0x33   : > { %1163 = vmatmul.mubr.msk.bf16.gmra.mrb[16].mxu1 %vm421_vm2, %v1212_v25  ;;  %1134 = vmatprep.mubr.msk.bf16.mxu0 %vm421_vm2, %v1213_v26 }
  0x34   : > { %1166 = vmatprep.mubr.msk.bf16.mxu1 %vm421_vm2, %v1214_v27 }
  0x3a   : > { %1135 = vmatmul.mubr.msk.bf16.gmra.mrb[20].mxu0 %vm421_vm2, %v1215_v28 }
  0x3b   : > { %1167 = vmatmul.mubr.msk.bf16.gmra.mrb[20].mxu1 %vm421_vm2, %v1216_v29  ;;  %1138 = vmatprep.mubr.msk.bf16.mxu0 %vm421_vm2, %v1217_v30 }
  0x3c   : > { %1170 = vmatprep.mubr.msk.bf16.mxu1 %vm421_vm2, %v1218_v31 }
  0x42   : > { %1139 = vmatmul.mubr.msk.bf16.gmra.mrb[24].mxu0 %vm421_vm2, %v1219_v32 }
  0x43   : > { %1171 = vmatmul.mubr.msk.bf16.gmra.mrb[24].mxu1 %vm421_vm2, %v1220_v33  ;;  %1142 = vmatprep.mubr.msk.bf16.mxu0 %vm421_vm2, %v1221_v34 }
  0x44   : > { %1174 = vmatprep.mubr.msk.bf16.mxu1 %vm421_vm2, %v1222_v35 }
  0x4a   : > { %1143 = vmatmul.mubr.msk.bf16.gmra.mrb[28].mxu0 %vm421_vm2, %v1223_v36 }
  0x4b   : > { %1175 = vmatmul.mubr.msk.bf16.gmra.mrb[28].mxu1 %vm421_vm2, %v1224_v37 }
  0xe5   : > { %v1116_v39 = vpop.f32.mrb[0].mxu0 }
  0xe6   : > { %v568_v40 = vadd.f32 %v1116_v39, %v1343_v38  ;;  %v1148_v41 = vpop.f32.mrb[0].mxu1  ;;  %v559_v42 = vpop.f32.mrb[1].mxu0 }
  0xe7   : > { %v696_v43 = vadd.f32 %v1148_v41, %v1343_v38  ;;  %v560_v44 = vadd.f32 %v1343_v38, %v559_v42  ;;  %v687_v45 = vpop.f32.mrb[1].mxu1  ;;  %v1117_v46 = vpop.f32.mrb[2].mxu0 }
  0xe8   : > { %v816_v47 = vmax.f32 %v568_v40, 0.0  ;;  %v688_v48 = vadd.f32 %v1343_v38, %v687_v45  ;;  %v571_v49 = vadd.f32 %v1117_v46, %v1343_v38  ;;  %v1149_v50 = vpop.f32.mrb[2].mxu1  ;;  %v562_v51 = vpop.f32.mrb[3].mxu0 }
  0xe9   : > { %v848_v52 = vmax.f32 %v696_v43, 0.0  ;;  %v814_v53 = vmax.f32 %v560_v44, 0.0  ;;  %v699_v54 = vadd.f32 %v1149_v50, %v1343_v38  ;;  %v563_v55 = vadd.f32 %v1343_v38, %v562_v51  ;;  %v690_v56 = vpop.f32.mrb[3].mxu1 }
  0xea   : > { %880 = vst [vmem:[%s1350_s28 + $0x10] sm:$0xff] %v816_v47  ;;  %v846_v57 = vmax.f32 %v688_v48, 0.0  ;;  %v817_v58 = vmax.f32 %v571_v49, 0.0  ;;  %v691_v59 = vadd.f32 %v1343_v38, %v690_v56 }
  0xeb   : > { %912 = vst [vmem:[%s1350_s28 + $0x110] sm:$0xff] %v848_v52  ;;  %878 = vst [vmem:[%s1350_s28] sm:$0xff] %v814_v53  ;;  %v849_v60 = vmax.f32 %v699_v54, 0.0  ;;  %v815_v61 = vmax.f32 %v563_v55, 0.0 }
  0xec   : > { %910 = vst [vmem:[%s1350_s28 + $0x100] sm:$0xff] %v846_v57  ;;  %881 = vst [vmem:[%s1350_s28 + $0x18] sm:$0xff] %v817_v58  ;;  %v847_v62 = vmax.f32 %v691_v59, 0.0 }
  0xed   : > { %913 = vst [vmem:[%s1350_s28 + $0x118] sm:$0xff] %v849_v60  ;;  %879 = vst [vmem:[%s1350_s28 + $0x8] sm:$0xff] %v815_v61  ;;  %v1120_v63 = vpop.f32.mrb[4].mxu0 }
  0xee   : > { %911 = vst [vmem:[%s1350_s28 + $0x108] sm:$0xff] %v847_v62  ;;  %v584_v0 = vadd.f32 %v1120_v63, %v1343_v38  ;;  %v1152_v1 = vpop.f32.mrb[4].mxu1  ;;  %v575_v2 = vpop.f32.mrb[5].mxu0 }
  0xef   : > { %v712_v3 = vadd.f32 %v1152_v1, %v1343_v38  ;;  %v576_v4 = vadd.f32 %v1343_v38, %v575_v2  ;;  %v703_v5 = vpop.f32.mrb[5].mxu1  ;;  %v1121_v6 = vpop.f32.mrb[6].mxu0 }
  0xf0   : > { %v820_v7 = vmax.f32 %v584_v0, 0.0  ;;  %v704_v8 = vadd.f32 %v1343_v38, %v703_v5  ;;  %v587_v9 = vadd.f32 %v1121_v6, %v1343_v38  ;;  %v1153_v10 = vpop.f32.mrb[6].mxu1  ;;  %v578_v11 = vpop.f32.mrb[7].mxu0 }
  0xf1   : > { %v852_v12 = vmax.f32 %v712_v3, 0.0  ;;  %v818_v13 = vmax.f32 %v576_v4, 0.0  ;;  %v715_v14 = vadd.f32 %v1153_v10, %v1343_v38  ;;  %v579_v15 = vadd.f32 %v1343_v38, %v578_v11  ;;  %v706_v16 = vpop.f32.mrb[7].mxu1 }
  0xf2   : > { %884 = vst [vmem:[%s1350_s28 + $0x30] sm:$0xff] %v820_v7  ;;  %v850_v17 = vmax.f32 %v704_v8, 0.0  ;;  %v821_v18 = vmax.f32 %v587_v9, 0.0  ;;  %v707_v19 = vadd.f32 %v1343_v38, %v706_v16 }
  0xf3   : > { %916 = vst [vmem:[%s1350_s28 + $0x130] sm:$0xff] %v852_v12  ;;  %882 = vst [vmem:[%s1350_s28 + $0x20] sm:$0xff] %v818_v13  ;;  %v853_v20 = vmax.f32 %v715_v14, 0.0  ;;  %v819_v21 = vmax.f32 %v579_v15, 0.0 }
  0xf4   : > { %914 = vst [vmem:[%s1350_s28 + $0x120] sm:$0xff] %v850_v17  ;;  %885 = vst [vmem:[%s1350_s28 + $0x38] sm:$0xff] %v821_v18  ;;  %v851_v22 = vmax.f32 %v707_v19, 0.0 }
  0xf5   : > { %917 = vst [vmem:[%s1350_s28 + $0x138] sm:$0xff] %v853_v20  ;;  %883 = vst [vmem:[%s1350_s28 + $0x28] sm:$0xff] %v819_v21  ;;  %v1124_v23 = vpop.f32.mrb[8].mxu0 }
  0xf6   : > { %915 = vst [vmem:[%s1350_s28 + $0x128] sm:$0xff] %v851_v22  ;;  %v600_v24 = vadd.f32 %v1124_v23, %v1343_v38  ;;  %v1156_v25 = vpop.f32.mrb[8].mxu1  ;;  %v591_v26 = vpop.f32.mrb[9].mxu0 }
  0xf7   : > { %v728_v27 = vadd.f32 %v1156_v25, %v1343_v38  ;;  %v592_v28 = vadd.f32 %v1343_v38, %v591_v26  ;;  %v719_v29 = vpop.f32.mrb[9].mxu1  ;;  %v1125_v30 = vpop.f32.mrb[10].mxu0 }
  0xf8   : > { %v824_v31 = vmax.f32 %v600_v24, 0.0  ;;  %v720_v32 = vadd.f32 %v1343_v38, %v719_v29  ;;  %v603_v33 = vadd.f32 %v1125_v30, %v1343_v38  ;;  %v1157_v34 = vpop.f32.mrb[10].mxu1  ;;  %v594_v35 = vpop.f32.mrb[11].mxu0 }
  0xf9   : > { %v856_v36 = vmax.f32 %v728_v27, 0.0  ;;  %v822_v37 = vmax.f32 %v592_v28, 0.0  ;;  %v731_v39 = vadd.f32 %v1157_v34, %v1343_v38  ;;  %v595_v40 = vadd.f32 %v1343_v38, %v594_v35  ;;  %v722_v41 = vpop.f32.mrb[11].mxu1 }
  0xfa   : > { %888 = vst [vmem:[%s1350_s28 + $0x50] sm:$0xff] %v824_v31  ;;  %v854_v42 = vmax.f32 %v720_v32, 0.0  ;;  %v825_v43 = vmax.f32 %v603_v33, 0.0  ;;  %v723_v44 = vadd.f32 %v1343_v38, %v722_v41 }
  0xfb   : > { %920 = vst [vmem:[%s1350_s28 + $0x150] sm:$0xff] %v856_v36  ;;  %886 = vst [vmem:[%s1350_s28 + $0x40] sm:$0xff] %v822_v37  ;;  %v857_v45 = vmax.f32 %v731_v39, 0.0  ;;  %v823_v46 = vmax.f32 %v595_v40, 0.0 }
  0xfc   : > { %918 = vst [vmem:[%s1350_s28 + $0x140] sm:$0xff] %v854_v42  ;;  %889 = vst [vmem:[%s1350_s28 + $0x58] sm:$0xff] %v825_v43  ;;  %v855_v47 = vmax.f32 %v723_v44, 0.0 }
  0xfd   : > { %921 = vst [vmem:[%s1350_s28 + $0x158] sm:$0xff] %v857_v45  ;;  %887 = vst [vmem:[%s1350_s28 + $0x48] sm:$0xff] %v823_v46  ;;  %v1128_v48 = vpop.f32.mrb[12].mxu0 }
  0xfe   : > { %919 = vst [vmem:[%s1350_s28 + $0x148] sm:$0xff] %v855_v47  ;;  %v616_v49 = vadd.f32 %v1128_v48, %v1343_v38  ;;  %v1160_v50 = vpop.f32.mrb[12].mxu1  ;;  %v607_v51 = vpop.f32.mrb[13].mxu0 }
  0xff   : > { %v744_v52 = vadd.f32 %v1160_v50, %v1343_v38  ;;  %v608_v53 = vadd.f32 %v1343_v38, %v607_v51  ;;  %v735_v54 = vpop.f32.mrb[13].mxu1  ;;  %v1129_v55 = vpop.f32.mrb[14].mxu0 }
 0x100   : > { %v828_v56 = vmax.f32 %v616_v49, 0.0  ;;  %v736_v57 = vadd.f32 %v1343_v38, %v735_v54  ;;  %v619_v58 = vadd.f32 %v1129_v55, %v1343_v38  ;;  %v1161_v59 = vpop.f32.mrb[14].mxu1  ;;  %v610_v60 = vpop.f32.mrb[15].mxu0 }
 0x101   : > { %v860_v61 = vmax.f32 %v744_v52, 0.0  ;;  %v826_v62 = vmax.f32 %v608_v53, 0.0  ;;  %v747_v63 = vadd.f32 %v1161_v59, %v1343_v38  ;;  %v611_v0 = vadd.f32 %v1343_v38, %v610_v60  ;;  %v738_v1 = vpop.f32.mrb[15].mxu1 }
 0x102   : > { %892 = vst [vmem:[%s1350_s28 + $0x70] sm:$0xff] %v828_v56  ;;  %v858_v2 = vmax.f32 %v736_v57, 0.0  ;;  %v829_v3 = vmax.f32 %v619_v58, 0.0  ;;  %v739_v4 = vadd.f32 %v1343_v38, %v738_v1 }
 0x103   : > { %924 = vst [vmem:[%s1350_s28 + $0x170] sm:$0xff] %v860_v61  ;;  %890 = vst [vmem:[%s1350_s28 + $0x60] sm:$0xff] %v826_v62  ;;  %v861_v5 = vmax.f32 %v747_v63, 0.0  ;;  %v827_v6 = vmax.f32 %v611_v0, 0.0 }
 0x104   : > { %922 = vst [vmem:[%s1350_s28 + $0x160] sm:$0xff] %v858_v2  ;;  %893 = vst [vmem:[%s1350_s28 + $0x78] sm:$0xff] %v829_v3  ;;  %v859_v7 = vmax.f32 %v739_v4, 0.0 }
 0x105   : > { %925 = vst [vmem:[%s1350_s28 + $0x178] sm:$0xff] %v861_v5  ;;  %891 = vst [vmem:[%s1350_s28 + $0x68] sm:$0xff] %v827_v6  ;;  %v1132_v8 = vpop.f32.mrb[16].mxu0 }
 0x106   : > { %923 = vst [vmem:[%s1350_s28 + $0x168] sm:$0xff] %v859_v7  ;;  %v632_v9 = vadd.f32 %v1132_v8, %v1343_v38  ;;  %v1164_v10 = vpop.f32.mrb[16].mxu1  ;;  %v623_v11 = vpop.f32.mrb[17].mxu0 }
 0x107   : > { %v760_v12 = vadd.f32 %v1164_v10, %v1343_v38  ;;  %v624_v13 = vadd.f32 %v1343_v38, %v623_v11  ;;  %v751_v14 = vpop.f32.mrb[17].mxu1  ;;  %v1133_v15 = vpop.f32.mrb[18].mxu0 }
 0x108   : > { %v832_v16 = vmax.f32 %v632_v9, 0.0  ;;  %v752_v17 = vadd.f32 %v1343_v38, %v751_v14  ;;  %v635_v18 = vadd.f32 %v1133_v15, %v1343_v38  ;;  %v1165_v19 = vpop.f32.mrb[18].mxu1  ;;  %v626_v20 = vpop.f32.mrb[19].mxu0 }
 0x109   : > { %v864_v21 = vmax.f32 %v760_v12, 0.0  ;;  %v830_v22 = vmax.f32 %v624_v13, 0.0  ;;  %v763_v23 = vadd.f32 %v1165_v19, %v1343_v38  ;;  %v627_v24 = vadd.f32 %v1343_v38, %v626_v20  ;;  %v754_v25 = vpop.f32.mrb[19].mxu1 }
 0x10a   : > { %896 = vst [vmem:[%s1350_s28 + $0x90] sm:$0xff] %v832_v16  ;;  %v862_v26 = vmax.f32 %v752_v17, 0.0  ;;  %v833_v27 = vmax.f32 %v635_v18, 0.0  ;;  %v755_v28 = vadd.f32 %v1343_v38, %v754_v25 }
 0x10b   : > { %928 = vst [vmem:[%s1350_s28 + $0x190] sm:$0xff] %v864_v21  ;;  %894 = vst [vmem:[%s1350_s28 + $0x80] sm:$0xff] %v830_v22  ;;  %v865_v29 = vmax.f32 %v763_v23, 0.0  ;;  %v831_v30 = vmax.f32 %v627_v24, 0.0 }
 0x10c   : > { %926 = vst [vmem:[%s1350_s28 + $0x180] sm:$0xff] %v862_v26  ;;  %897 = vst [vmem:[%s1350_s28 + $0x98] sm:$0xff] %v833_v27  ;;  %v863_v31 = vmax.f32 %v755_v28, 0.0 }
 0x10d   : > { %929 = vst [vmem:[%s1350_s28 + $0x198] sm:$0xff] %v865_v29  ;;  %895 = vst [vmem:[%s1350_s28 + $0x88] sm:$0xff] %v831_v30  ;;  %v1136_v32 = vpop.f32.mrb[20].mxu0 }
 0x10e   : > { %927 = vst [vmem:[%s1350_s28 + $0x188] sm:$0xff] %v863_v31  ;;  %v648_v33 = vadd.f32 %v1136_v32, %v1343_v38  ;;  %v1168_v34 = vpop.f32.mrb[20].mxu1  ;;  %v639_v35 = vpop.f32.mrb[21].mxu0 }
 0x10f   : > { %v776_v36 = vadd.f32 %v1168_v34, %v1343_v38  ;;  %v640_v37 = vadd.f32 %v1343_v38, %v639_v35  ;;  %v767_v39 = vpop.f32.mrb[21].mxu1  ;;  %v1137_v40 = vpop.f32.mrb[22].mxu0 }
 0x110   : > { %v836_v41 = vmax.f32 %v648_v33, 0.0  ;;  %v768_v42 = vadd.f32 %v1343_v38, %v767_v39  ;;  %v651_v43 = vadd.f32 %v1137_v40, %v1343_v38  ;;  %v1169_v44 = vpop.f32.mrb[22].mxu1  ;;  %v642_v45 = vpop.f32.mrb[23].mxu0 }
 0x111   : > { %v868_v46 = vmax.f32 %v776_v36, 0.0  ;;  %v834_v47 = vmax.f32 %v640_v37, 0.0  ;;  %v779_v48 = vadd.f32 %v1169_v44, %v1343_v38  ;;  %v643_v49 = vadd.f32 %v1343_v38, %v642_v45  ;;  %v770_v50 = vpop.f32.mrb[23].mxu1 }
 0x112   : > { %900 = vst [vmem:[%s1350_s28 + $0xb0] sm:$0xff] %v836_v41  ;;  %v866_v51 = vmax.f32 %v768_v42, 0.0  ;;  %v837_v52 = vmax.f32 %v651_v43, 0.0  ;;  %v771_v53 = vadd.f32 %v1343_v38, %v770_v50 }
 0x113   : > { %932 = vst [vmem:[%s1350_s28 + $0x1b0] sm:$0xff] %v868_v46  ;;  %898 = vst [vmem:[%s1350_s28 + $0xa0] sm:$0xff] %v834_v47  ;;  %v869_v54 = vmax.f32 %v779_v48, 0.0  ;;  %v835_v55 = vmax.f32 %v643_v49, 0.0 }
 0x114   : > { %930 = vst [vmem:[%s1350_s28 + $0x1a0] sm:$0xff] %v866_v51  ;;  %901 = vst [vmem:[%s1350_s28 + $0xb8] sm:$0xff] %v837_v52  ;;  %v867_v56 = vmax.f32 %v771_v53, 0.0 }
 0x115   : > { %933 = vst [vmem:[%s1350_s28 + $0x1b8] sm:$0xff] %v869_v54  ;;  %899 = vst [vmem:[%s1350_s28 + $0xa8] sm:$0xff] %v835_v55  ;;  %v1140_v57 = vpop.f32.mrb[24].mxu0 }
 0x116   : > { %931 = vst [vmem:[%s1350_s28 + $0x1a8] sm:$0xff] %v867_v56  ;;  %v664_v58 = vadd.f32 %v1140_v57, %v1343_v38  ;;  %v1172_v59 = vpop.f32.mrb[24].mxu1  ;;  %v655_v60 = vpop.f32.mrb[25].mxu0 }
 0x117   : > { %v792_v61 = vadd.f32 %v1172_v59, %v1343_v38  ;;  %v656_v62 = vadd.f32 %v1343_v38, %v655_v60  ;;  %v783_v63 = vpop.f32.mrb[25].mxu1  ;;  %v1141_v0 = vpop.f32.mrb[26].mxu0 }
 0x118   : > { %v840_v1 = vmax.f32 %v664_v58, 0.0  ;;  %v784_v2 = vadd.f32 %v1343_v38, %v783_v63  ;;  %v667_v3 = vadd.f32 %v1141_v0, %v1343_v38  ;;  %v1173_v4 = vpop.f32.mrb[26].mxu1  ;;  %v658_v5 = vpop.f32.mrb[27].mxu0 }
 0x119   : > { %v872_v6 = vmax.f32 %v792_v61, 0.0  ;;  %v838_v7 = vmax.f32 %v656_v62, 0.0  ;;  %v795_v8 = vadd.f32 %v1173_v4, %v1343_v38  ;;  %v659_v9 = vadd.f32 %v1343_v38, %v658_v5  ;;  %v786_v10 = vpop.f32.mrb[27].mxu1 }
 0x11a   : > { %904 = vst [vmem:[%s1350_s28 + $0xd0] sm:$0xff] %v840_v1  ;;  %v870_v11 = vmax.f32 %v784_v2, 0.0  ;;  %v841_v12 = vmax.f32 %v667_v3, 0.0  ;;  %v787_v13 = vadd.f32 %v1343_v38, %v786_v10 }
 0x11b   : > { %936 = vst [vmem:[%s1350_s28 + $0x1d0] sm:$0xff] %v872_v6  ;;  %902 = vst [vmem:[%s1350_s28 + $0xc0] sm:$0xff] %v838_v7  ;;  %v873_v14 = vmax.f32 %v795_v8, 0.0  ;;  %v839_v15 = vmax.f32 %v659_v9, 0.0 }
 0x11c   : > { %934 = vst [vmem:[%s1350_s28 + $0x1c0] sm:$0xff] %v870_v11  ;;  %905 = vst [vmem:[%s1350_s28 + $0xd8] sm:$0xff] %v841_v12  ;;  %v871_v16 = vmax.f32 %v787_v13, 0.0 }
 0x11d   : > { %937 = vst [vmem:[%s1350_s28 + $0x1d8] sm:$0xff] %v873_v14  ;;  %903 = vst [vmem:[%s1350_s28 + $0xc8] sm:$0xff] %v839_v15  ;;  %v1144_v17 = vpop.f32.mrb[28].mxu0 }
 0x11e   : > { %935 = vst [vmem:[%s1350_s28 + $0x1c8] sm:$0xff] %v871_v16  ;;  %v680_v18 = vadd.f32 %v1144_v17, %v1343_v38  ;;  %v1176_v19 = vpop.f32.mrb[28].mxu1  ;;  %v671_v20 = vpop.f32.mrb[29].mxu0 }
 0x11f   : > { %v808_v21 = vadd.f32 %v1176_v19, %v1343_v38  ;;  %v672_v22 = vadd.f32 %v1343_v38, %v671_v20  ;;  %v799_v23 = vpop.f32.mrb[29].mxu1  ;;  %v1145_v24 = vpop.f32.mrb[30].mxu0 }
 0x120   : > { %v844_v25 = vmax.f32 %v680_v18, 0.0  ;;  %v800_v26 = vadd.f32 %v1343_v38, %v799_v23  ;;  %v683_v27 = vadd.f32 %v1145_v24, %v1343_v38  ;;  %v1177_v28 = vpop.f32.mrb[30].mxu1  ;;  %v674_v29 = vpop.f32.mrb[31].mxu0 }
 0x121   : > { %v876_v30 = vmax.f32 %v808_v21, 0.0  ;;  %v842_v31 = vmax.f32 %v672_v22, 0.0  ;;  %v811_v32 = vadd.f32 %v1177_v28, %v1343_v38  ;;  %v675_v33 = vadd.f32 %v1343_v38, %v674_v29  ;;  %v802_v34 = vpop.f32.mrb[31].mxu1 }
 0x122   : > { %908 = vst [vmem:[%s1350_s28 + $0xf0] sm:$0xff] %v844_v25  ;;  %v874_v35 = vmax.f32 %v800_v26, 0.0  ;;  %v845_v36 = vmax.f32 %v683_v27, 0.0  ;;  %v803_v37 = vadd.f32 %v1343_v38, %v802_v34 }
 0x123   : > { %940 = vst [vmem:[%s1350_s28 + $0x1f0] sm:$0xff] %v876_v30  ;;  %906 = vst [vmem:[%s1350_s28 + $0xe0] sm:$0xff] %v842_v31  ;;  %v877_v39 = vmax.f32 %v811_v32, 0.0  ;;  %v843_v40 = vmax.f32 %v675_v33, 0.0 }
 0x124   : > { %938 = vst [vmem:[%s1350_s28 + $0x1e0] sm:$0xff] %v874_v35  ;;  %909 = vst [vmem:[%s1350_s28 + $0xf8] sm:$0xff] %v845_v36  ;;  %v875_v41 = vmax.f32 %v803_v37, 0.0 }
 0x125   : > { %941 = vst [vmem:[%s1350_s28 + $0x1f8] sm:$0xff] %v877_v39  ;;  %907 = vst [vmem:[%s1350_s28 + $0xe8] sm:$0xff] %v843_v40 }
 0x126   : > { %939 = vst [vmem:[%s1350_s28 + $0x1e8] sm:$0xff] %v875_v41 }
 0x127 PF: > { %s13_s12 = sadd.s32 1, %s1231_s12  }
 0x128   : > { %p10_p4 = scmp.ge.s32.totalorder %s13_s12, 6  }
 0x12a   :  { %12 = sbr.rel (!%p10_p4) target bundleno = 1 (0x1), region = 62 }

// kernel: _forward_impl.7
= control target key start
LH: loop header
LB: loop body
LE: loop exit
PB: predicated region body
PF: predicated region fallthrough
CT: control target
= control target key end

     0   :  { %vm282_vm0 = vcmask 588800   ;;  %vm379_vm1 = vcmask 1043456   ;;  %s1458_s1 = inlined_call_operand.vmem [shape: bf16[72,128], index: 1, kind: input, shape index: {}]   ;;  %s1459_s0 = inlined_call_operand.vmem [shape: bf16[512,72], index: 0, kind: input, shape index: {}]   ;;  %s1460_s2 = inlined_call_operand.vmem [shape: f32[1,128], index: 2, kind: input, shape index: {}]   ;;  %s1461_s3 = inlined_call_operand.vmem [shape: f32[512,128], index: 3, kind: output, shape index: {}]  }
   0x1   :  { %v997_v0 = vld [vmem:[%s1458_s1] sm:$0xff]   ;;  %v998_v1 = vld [vmem:[%s1458_s1 + $0x8] sm:$0xff]   ;;  %v999_v2 = vld [vmem:[%s1458_s1 + $0x10] sm:$0xff]  }
   0x2   :  { %911 = vmatprep.subr.bf16.mxu0 %v997_v0  ;;  %985 = vmatprep.subr.bf16.mxu1 %v997_v0  ;;  %v1002_v3 = vld [vmem:[%s1459_s0] sm:$0xff]   ;;  %v1000_v5 = vld [vmem:[%s1458_s1 + $0x18] sm:$0xff]   ;;  %v1004_v8 = vld [vmem:[%s1459_s0 + $0x8] sm:$0xff]  }
   0x3   :  { %912 = vmatpush3.bf16.msra.mxu0 %v997_v0  ;;  %990 = vmatpush3.bf16.msra.mxu1 %v997_v0  ;;  %v1003_v4 = vld [vmem:[%s1459_s0 + $0x80] sm:$0xff]   ;;  %v1005_v9 = vld [vmem:[%s1459_s0 + $0x88] sm:$0xff]   ;;  %v1006_v10 = vld [vmem:[%s1459_s0 + $0x10] sm:$0xff]  }
   0x4   :  { %913 = vmatprep.subr.bf16.mxu0 %v998_v1  ;;  %986 = vmatprep.subr.bf16.mxu1 %v998_v1  ;;  %v1001_v6 = vld [vmem:[%s1458_s1 + $0x20] ss:$0 sps:$4 sm:$0xff]   ;;  %v1007_v11 = vld [vmem:[%s1459_s0 + $0x90] sm:$0xff]   ;;  %v1008_v12 = vld [vmem:[%s1459_s0 + $0x18] sm:$0xff]  }
   0x5   :  { %921 = vmatprep.mubr.msk.bf16.mxu0 %vm282_vm0, %v1002_v3  ;;  %953 = vmatprep.mubr.msk.bf16.mxu1 %vm282_vm0, %v1003_v4  ;;  %v381_v7 = vsel %vm379_vm1, %v1001_v6, 0  ;;  %v1009_v13 = vld [vmem:[%s1459_s0 + $0x98] sm:$0xff]   ;;  %v1010_v14 = vld [vmem:[%s1459_s0 + $0x20] sm:$0xff]   ;;  %v1012_v16 = vld [vmem:[%s1459_s0 + $0x28] sm:$0xff]  }
   0x6   :  { %v1011_v15 = vld [vmem:[%s1459_s0 + $0xa0] sm:$0xff]   ;;  %v1013_v17 = vld [vmem:[%s1459_s0 + $0xa8] sm:$0xff]   ;;  %v1014_v18 = vld [vmem:[%s1459_s0 + $0x30] sm:$0xff]  }
   0x7   :  { %914 = vmatpush3.bf16.msra.mxu0 %v998_v1  ;;  %991 = vmatpush3.bf16.msra.mxu1 %v998_v1  ;;  %v1015_v19 = vld [vmem:[%s1459_s0 + $0xb0] sm:$0xff]   ;;  %v1016_v20 = vld [vmem:[%s1459_s0 + $0x38] sm:$0xff]   ;;  %v1018_v22 = vld [vmem:[%s1459_s0 + $0x40] sm:$0xff]  }
   0x8   :  { %915 = vmatprep.subr.bf16.mxu0 %v999_v2  ;;  %987 = vmatprep.subr.bf16.mxu1 %v999_v2  ;;  %v1017_v21 = vld [vmem:[%s1459_s0 + $0xb8] sm:$0xff]   ;;  %v1019_v23 = vld [vmem:[%s1459_s0 + $0xc0] sm:$0xff]   ;;  %v1020_v24 = vld [vmem:[%s1459_s0 + $0x48] sm:$0xff]  }
   0x9   :  { %v1021_v25 = vld [vmem:[%s1459_s0 + $0xc8] sm:$0xff]   ;;  %v1022_v26 = vld [vmem:[%s1459_s0 + $0x50] sm:$0xff]   ;;  %v1024_v28 = vld [vmem:[%s1459_s0 + $0x58] sm:$0xff]  }
   0xa   :  { %v1023_v27 = vld [vmem:[%s1459_s0 + $0xd0] sm:$0xff]   ;;  %v1025_v29 = vld [vmem:[%s1459_s0 + $0xd8] sm:$0xff]   ;;  %v1026_v30 = vld [vmem:[%s1459_s0 + $0x60] sm:$0xff]  }
   0xb   :  { %916 = vmatpush3.bf16.msra.mxu0 %v999_v2  ;;  %992 = vmatpush3.bf16.msra.mxu1 %v999_v2  ;;  %v1027_v31 = vld [vmem:[%s1459_s0 + $0xe0] sm:$0xff]   ;;  %v1028_v32 = vld [vmem:[%s1459_s0 + $0x68] sm:$0xff]   ;;  %v1030_v34 = vld [vmem:[%s1459_s0 + $0x70] sm:$0xff]  }
   0xc   :  { %917 = vmatprep.subr.bf16.mxu0 %v1000_v5  ;;  %988 = vmatprep.subr.bf16.mxu1 %v1000_v5  ;;  %v1029_v33 = vld [vmem:[%s1459_s0 + $0xe8] sm:$0xff]   ;;  %v1031_v35 = vld [vmem:[%s1459_s0 + $0xf0] sm:$0xff]   ;;  %v1032_v36 = vld [vmem:[%s1459_s0 + $0x78] sm:$0xff]  }
   0xd   :  { %v1033_v37 = vld [vmem:[%s1459_s0 + $0xf8] sm:$0xff]   ;;  %v1200_v38 = vld [vmem:[%s1460_s2] ss:$0 sm:$0xff] }
   0xf   :  { %918 = vmatpush3.bf16.msra.mxu0 %v1000_v5  ;;  %993 = vmatpush3.bf16.msra.mxu1 %v1000_v5 }
  0x10   :  { %995 = vmatprep.subr.msk.bf16.mxu0 %vm379_vm1, %v1001_v6  ;;  %996 = vmatprep.subr.msk.bf16.mxu1 %vm379_vm1, %v1001_v6 }
  0x13   :  { %920 = vmatpush3.bf16.msra.mxu0 %v381_v7  ;;  %994 = vmatpush3.bf16.msra.mxu1 %v381_v7 }
  0x16   :  { %922 = vmatmul.mubr.msk.bf16.vlgmr.msra.gmra.mrb[0].mxu0 %vm282_vm0, %v1004_v8  ;;  %954 = vmatmul.mubr.msk.bf16.vlgmr.msra.gmra.mrb[0].mxu1 %vm282_vm0, %v1005_v9 }
  0x17   :  { %925 = vmatprep.mubr.msk.bf16.mxu0 %vm282_vm0, %v1006_v10  ;;  %957 = vmatprep.mubr.msk.bf16.mxu1 %vm282_vm0, %v1007_v11 }
  0x1e   :  { %926 = vmatmul.mubr.msk.bf16.gmra.mrb[4].mxu0 %vm282_vm0, %v1008_v12  ;;  %958 = vmatmul.mubr.msk.bf16.gmra.mrb[4].mxu1 %vm282_vm0, %v1009_v13 }
  0x1f   :  { %929 = vmatprep.mubr.msk.bf16.mxu0 %vm282_vm0, %v1010_v14  ;;  %961 = vmatprep.mubr.msk.bf16.mxu1 %vm282_vm0, %v1011_v15 }
  0x26   :  { %930 = vmatmul.mubr.msk.bf16.gmra.mrb[8].mxu0 %vm282_vm0, %v1012_v16  ;;  %962 = vmatmul.mubr.msk.bf16.gmra.mrb[8].mxu1 %vm282_vm0, %v1013_v17 }
  0x27   :  { %933 = vmatprep.mubr.msk.bf16.mxu0 %vm282_vm0, %v1014_v18  ;;  %965 = vmatprep.mubr.msk.bf16.mxu1 %vm282_vm0, %v1015_v19 }
  0x2e   :  { %934 = vmatmul.mubr.msk.bf16.gmra.mrb[12].mxu0 %vm282_vm0, %v1016_v20  ;;  %966 = vmatmul.mubr.msk.bf16.gmra.mrb[12].mxu1 %vm282_vm0, %v1017_v21 }
  0x2f   :  { %937 = vmatprep.mubr.msk.bf16.mxu0 %vm282_vm0, %v1018_v22  ;;  %969 = vmatprep.mubr.msk.bf16.mxu1 %vm282_vm0, %v1019_v23 }
  0x36   :  { %938 = vmatmul.mubr.msk.bf16.gmra.mrb[16].mxu0 %vm282_vm0, %v1020_v24  ;;  %970 = vmatmul.mubr.msk.bf16.gmra.mrb[16].mxu1 %vm282_vm0, %v1021_v25 }
  0x37   :  { %941 = vmatprep.mubr.msk.bf16.mxu0 %vm282_vm0, %v1022_v26  ;;  %973 = vmatprep.mubr.msk.bf16.mxu1 %vm282_vm0, %v1023_v27 }
  0x3e   :  { %942 = vmatmul.mubr.msk.bf16.gmra.mrb[20].mxu0 %vm282_vm0, %v1024_v28  ;;  %974 = vmatmul.mubr.msk.bf16.gmra.mrb[20].mxu1 %vm282_vm0, %v1025_v29 }
  0x3f   :  { %945 = vmatprep.mubr.msk.bf16.mxu0 %vm282_vm0, %v1026_v30  ;;  %977 = vmatprep.mubr.msk.bf16.mxu1 %vm282_vm0, %v1027_v31 }
  0x46   :  { %946 = vmatmul.mubr.msk.bf16.gmra.mrb[24].mxu0 %vm282_vm0, %v1028_v32  ;;  %978 = vmatmul.mubr.msk.bf16.gmra.mrb[24].mxu1 %vm282_vm0, %v1029_v33 }
  0x47   :  { %949 = vmatprep.mubr.msk.bf16.mxu0 %vm282_vm0, %v1030_v34  ;;  %981 = vmatprep.mubr.msk.bf16.mxu1 %vm282_vm0, %v1031_v35 }
  0x4e   :  { %950 = vmatmul.mubr.msk.bf16.gmra.mrb[28].mxu0 %vm282_vm0, %v1032_v36  ;;  %982 = vmatmul.mubr.msk.bf16.gmra.mrb[28].mxu1 %vm282_vm0, %v1033_v37 }
  0xe9   :  { %v923_v39 = vpop.f32.mrb[0].mxu0  ;;  %v955_v40 = vpop.f32.mrb[0].mxu1 }
  0xea   :  { %v426_v41 = vadd.f32 %v923_v39, %v1200_v38  ;;  %v554_v42 = vadd.f32 %v955_v40, %v1200_v38  ;;  %v417_v43 = vpop.f32.mrb[1].mxu0  ;;  %v545_v44 = vpop.f32.mrb[1].mxu1 }
  0xeb   :  { %v418_v45 = vadd.f32 %v1200_v38, %v417_v43  ;;  %v546_v46 = vadd.f32 %v1200_v38, %v545_v44  ;;  %v924_v47 = vpop.f32.mrb[2].mxu0  ;;  %v956_v48 = vpop.f32.mrb[2].mxu1 }
  0xec   :  { %v674_v49 = vmax.f32 %v426_v41, 0.0  ;;  %v706_v50 = vmax.f32 %v554_v42, 0.0  ;;  %v429_v51 = vadd.f32 %v924_v47, %v1200_v38  ;;  %v557_v52 = vadd.f32 %v956_v48, %v1200_v38  ;;  %v420_v53 = vpop.f32.mrb[3].mxu0  ;;  %v548_v54 = vpop.f32.mrb[3].mxu1 }
  0xed   :  { %v672_v55 = vmax.f32 %v418_v45, 0.0  ;;  %v704_v56 = vmax.f32 %v546_v46, 0.0  ;;  %v421_v57 = vadd.f32 %v1200_v38, %v420_v53  ;;  %v549_v58 = vadd.f32 %v1200_v38, %v548_v54 }
  0xee   :  { %738 = vst [vmem:[%s1461_s3 + $0x10] sm:$0xff] %v674_v49  ;;  %770 = vst [vmem:[%s1461_s3 + $0x110] sm:$0xff] %v706_v50  ;;  %v675_v59 = vmax.f32 %v429_v51, 0.0  ;;  %v707_v60 = vmax.f32 %v557_v52, 0.0 }
  0xef   :  { %736 = vst [vmem:[%s1461_s3] sm:$0xff] %v672_v55  ;;  %768 = vst [vmem:[%s1461_s3 + $0x100] sm:$0xff] %v704_v56  ;;  %v673_v61 = vmax.f32 %v421_v57, 0.0  ;;  %v705_v62 = vmax.f32 %v549_v58, 0.0 }
  0xf0   :  { %739 = vst [vmem:[%s1461_s3 + $0x18] sm:$0xff] %v675_v59  ;;  %771 = vst [vmem:[%s1461_s3 + $0x118] sm:$0xff] %v707_v60 }
  0xf1   :  { %737 = vst [vmem:[%s1461_s3 + $0x8] sm:$0xff] %v673_v61  ;;  %769 = vst [vmem:[%s1461_s3 + $0x108] sm:$0xff] %v705_v62  ;;  %v927_v63 = vpop.f32.mrb[4].mxu0  ;;  %v959_v0 = vpop.f32.mrb[4].mxu1 }
  0xf2   :  { %v442_v1 = vadd.f32 %v927_v63, %v1200_v38  ;;  %v570_v2 = vadd.f32 %v959_v0, %v1200_v38  ;;  %v433_v3 = vpop.f32.mrb[5].mxu0  ;;  %v561_v4 = vpop.f32.mrb[5].mxu1 }
  0xf3   :  { %v434_v5 = vadd.f32 %v1200_v38, %v433_v3  ;;  %v562_v6 = vadd.f32 %v1200_v38, %v561_v4  ;;  %v928_v7 = vpop.f32.mrb[6].mxu0  ;;  %v960_v8 = vpop.f32.mrb[6].mxu1 }
  0xf4   :  { %v678_v9 = vmax.f32 %v442_v1, 0.0  ;;  %v710_v10 = vmax.f32 %v570_v2, 0.0  ;;  %v445_v11 = vadd.f32 %v928_v7, %v1200_v38  ;;  %v573_v12 = vadd.f32 %v960_v8, %v1200_v38  ;;  %v436_v13 = vpop.f32.mrb[7].mxu0  ;;  %v564_v14 = vpop.f32.mrb[7].mxu1 }
  0xf5   :  { %v676_v15 = vmax.f32 %v434_v5, 0.0  ;;  %v708_v16 = vmax.f32 %v562_v6, 0.0  ;;  %v437_v17 = vadd.f32 %v1200_v38, %v436_v13  ;;  %v565_v18 = vadd.f32 %v1200_v38, %v564_v14 }
  0xf6   :  { %742 = vst [vmem:[%s1461_s3 + $0x30] sm:$0xff] %v678_v9  ;;  %774 = vst [vmem:[%s1461_s3 + $0x130] sm:$0xff] %v710_v10  ;;  %v679_v19 = vmax.f32 %v445_v11, 0.0  ;;  %v711_v20 = vmax.f32 %v573_v12, 0.0 }
  0xf7   :  { %740 = vst [vmem:[%s1461_s3 + $0x20] sm:$0xff] %v676_v15  ;;  %772 = vst [vmem:[%s1461_s3 + $0x120] sm:$0xff] %v708_v16  ;;  %v677_v21 = vmax.f32 %v437_v17, 0.0  ;;  %v709_v22 = vmax.f32 %v565_v18, 0.0 }
  0xf8   :  { %743 = vst [vmem:[%s1461_s3 + $0x38] sm:$0xff] %v679_v19  ;;  %775 = vst [vmem:[%s1461_s3 + $0x138] sm:$0xff] %v711_v20 }
  0xf9   :  { %741 = vst [vmem:[%s1461_s3 + $0x28] sm:$0xff] %v677_v21  ;;  %773 = vst [vmem:[%s1461_s3 + $0x128] sm:$0xff] %v709_v22  ;;  %v931_v23 = vpop.f32.mrb[8].mxu0  ;;  %v963_v24 = vpop.f32.mrb[8].mxu1 }
  0xfa   :  { %v458_v25 = vadd.f32 %v931_v23, %v1200_v38  ;;  %v586_v26 = vadd.f32 %v963_v24, %v1200_v38  ;;  %v449_v27 = vpop.f32.mrb[9].mxu0  ;;  %v577_v28 = vpop.f32.mrb[9].mxu1 }
  0xfb   :  { %v450_v29 = vadd.f32 %v1200_v38, %v449_v27  ;;  %v578_v30 = vadd.f32 %v1200_v38, %v577_v28  ;;  %v932_v31 = vpop.f32.mrb[10].mxu0  ;;  %v964_v32 = vpop.f32.mrb[10].mxu1 }
  0xfc   :  { %v682_v33 = vmax.f32 %v458_v25, 0.0  ;;  %v714_v34 = vmax.f32 %v586_v26, 0.0  ;;  %v461_v35 = vadd.f32 %v932_v31, %v1200_v38  ;;  %v589_v36 = vadd.f32 %v964_v32, %v1200_v38  ;;  %v452_v37 = vpop.f32.mrb[11].mxu0  ;;  %v580_v39 = vpop.f32.mrb[11].mxu1 }
  0xfd   :  { %v680_v40 = vmax.f32 %v450_v29, 0.0  ;;  %v712_v41 = vmax.f32 %v578_v30, 0.0  ;;  %v453_v42 = vadd.f32 %v1200_v38, %v452_v37  ;;  %v581_v43 = vadd.f32 %v1200_v38, %v580_v39 }
  0xfe   :  { %746 = vst [vmem:[%s1461_s3 + $0x50] sm:$0xff] %v682_v33  ;;  %778 = vst [vmem:[%s1461_s3 + $0x150] sm:$0xff] %v714_v34  ;;  %v683_v44 = vmax.f32 %v461_v35, 0.0  ;;  %v715_v45 = vmax.f32 %v589_v36, 0.0 }
  0xff   :  { %744 = vst [vmem:[%s1461_s3 + $0x40] sm:$0xff] %v680_v40  ;;  %776 = vst [vmem:[%s1461_s3 + $0x140] sm:$0xff] %v712_v41  ;;  %v681_v46 = vmax.f32 %v453_v42, 0.0  ;;  %v713_v47 = vmax.f32 %v581_v43, 0.0 }
 0x100   :  { %747 = vst [vmem:[%s1461_s3 + $0x58] sm:$0xff] %v683_v44  ;;  %779 = vst [vmem:[%s1461_s3 + $0x158] sm:$0xff] %v715_v45 }
 0x101   :  { %745 = vst [vmem:[%s1461_s3 + $0x48] sm:$0xff] %v681_v46  ;;  %777 = vst [vmem:[%s1461_s3 + $0x148] sm:$0xff] %v713_v47  ;;  %v935_v48 = vpop.f32.mrb[12].mxu0  ;;  %v967_v49 = vpop.f32.mrb[12].mxu1 }
 0x102   :  { %v474_v50 = vadd.f32 %v935_v48, %v1200_v38  ;;  %v602_v51 = vadd.f32 %v967_v49, %v1200_v38  ;;  %v465_v52 = vpop.f32.mrb[13].mxu0  ;;  %v593_v53 = vpop.f32.mrb[13].mxu1 }
 0x103   :  { %v466_v54 = vadd.f32 %v1200_v38, %v465_v52  ;;  %v594_v55 = vadd.f32 %v1200_v38, %v593_v53  ;;  %v936_v56 = vpop.f32.mrb[14].mxu0  ;;  %v968_v57 = vpop.f32.mrb[14].mxu1 }
 0x104   :  { %v686_v58 = vmax.f32 %v474_v50, 0.0  ;;  %v718_v59 = vmax.f32 %v602_v51, 0.0  ;;  %v477_v60 = vadd.f32 %v936_v56, %v1200_v38  ;;  %v605_v61 = vadd.f32 %v968_v57, %v1200_v38  ;;  %v468_v62 = vpop.f32.mrb[15].mxu0  ;;  %v596_v63 = vpop.f32.mrb[15].mxu1 }
 0x105   :  { %v684_v0 = vmax.f32 %v466_v54, 0.0  ;;  %v716_v1 = vmax.f32 %v594_v55, 0.0  ;;  %v469_v2 = vadd.f32 %v1200_v38, %v468_v62  ;;  %v597_v3 = vadd.f32 %v1200_v38, %v596_v63 }
 0x106   :  { %750 = vst [vmem:[%s1461_s3 + $0x70] sm:$0xff] %v686_v58  ;;  %782 = vst [vmem:[%s1461_s3 + $0x170] sm:$0xff] %v718_v59  ;;  %v687_v4 = vmax.f32 %v477_v60, 0.0  ;;  %v719_v5 = vmax.f32 %v605_v61, 0.0 }
 0x107   :  { %748 = vst [vmem:[%s1461_s3 + $0x60] sm:$0xff] %v684_v0  ;;  %780 = vst [vmem:[%s1461_s3 + $0x160] sm:$0xff] %v716_v1  ;;  %v685_v6 = vmax.f32 %v469_v2, 0.0  ;;  %v717_v7 = vmax.f32 %v597_v3, 0.0 }
 0x108   :  { %751 = vst [vmem:[%s1461_s3 + $0x78] sm:$0xff] %v687_v4  ;;  %783 = vst [vmem:[%s1461_s3 + $0x178] sm:$0xff] %v719_v5 }
 0x109   :  { %749 = vst [vmem:[%s1461_s3 + $0x68] sm:$0xff] %v685_v6  ;;  %781 = vst [vmem:[%s1461_s3 + $0x168] sm:$0xff] %v717_v7  ;;  %v939_v8 = vpop.f32.mrb[16].mxu0  ;;  %v971_v9 = vpop.f32.mrb[16].mxu1 }
 0x10a   :  { %v490_v10 = vadd.f32 %v939_v8, %v1200_v38  ;;  %v618_v11 = vadd.f32 %v971_v9, %v1200_v38  ;;  %v481_v12 = vpop.f32.mrb[17].mxu0  ;;  %v609_v13 = vpop.f32.mrb[17].mxu1 }
 0x10b   :  { %v482_v14 = vadd.f32 %v1200_v38, %v481_v12  ;;  %v610_v15 = vadd.f32 %v1200_v38, %v609_v13  ;;  %v940_v16 = vpop.f32.mrb[18].mxu0  ;;  %v972_v17 = vpop.f32.mrb[18].mxu1 }
 0x10c   :  { %v690_v18 = vmax.f32 %v490_v10, 0.0  ;;  %v722_v19 = vmax.f32 %v618_v11, 0.0  ;;  %v493_v20 = vadd.f32 %v940_v16, %v1200_v38  ;;  %v621_v21 = vadd.f32 %v972_v17, %v1200_v38  ;;  %v484_v22 = vpop.f32.mrb[19].mxu0  ;;  %v612_v23 = vpop.f32.mrb[19].mxu1 }
 0x10d   :  { %v688_v24 = vmax.f32 %v482_v14, 0.0  ;;  %v720_v25 = vmax.f32 %v610_v15, 0.0  ;;  %v485_v26 = vadd.f32 %v1200_v38, %v484_v22  ;;  %v613_v27 = vadd.f32 %v1200_v38, %v612_v23 }
 0x10e   :  { %754 = vst [vmem:[%s1461_s3 + $0x90] sm:$0xff] %v690_v18  ;;  %786 = vst [vmem:[%s1461_s3 + $0x190] sm:$0xff] %v722_v19  ;;  %v691_v28 = vmax.f32 %v493_v20, 0.0  ;;  %v723_v29 = vmax.f32 %v621_v21, 0.0 }
 0x10f   :  { %752 = vst [vmem:[%s1461_s3 + $0x80] sm:$0xff] %v688_v24  ;;  %784 = vst [vmem:[%s1461_s3 + $0x180] sm:$0xff] %v720_v25  ;;  %v689_v30 = vmax.f32 %v485_v26, 0.0  ;;  %v721_v31 = vmax.f32 %v613_v27, 0.0 }
 0x110   :  { %755 = vst [vmem:[%s1461_s3 + $0x98] sm:$0xff] %v691_v28  ;;  %787 = vst [vmem:[%s1461_s3 + $0x198] sm:$0xff] %v723_v29 }
 0x111   :  { %753 = vst [vmem:[%s1461_s3 + $0x88] sm:$0xff] %v689_v30  ;;  %785 = vst [vmem:[%s1461_s3 + $0x188] sm:$0xff] %v721_v31  ;;  %v943_v32 = vpop.f32.mrb[20].mxu0  ;;  %v975_v33 = vpop.f32.mrb[20].mxu1 }
 0x112   :  { %v506_v34 = vadd.f32 %v943_v32, %v1200_v38  ;;  %v634_v35 = vadd.f32 %v975_v33, %v1200_v38  ;;  %v497_v36 = vpop.f32.mrb[21].mxu0  ;;  %v625_v37 = vpop.f32.mrb[21].mxu1 }
 0x113   :  { %v498_v39 = vadd.f32 %v1200_v38, %v497_v36  ;;  %v626_v40 = vadd.f32 %v1200_v38, %v625_v37  ;;  %v944_v41 = vpop.f32.mrb[22].mxu0  ;;  %v976_v42 = vpop.f32.mrb[22].mxu1 }
 0x114   :  { %v694_v43 = vmax.f32 %v506_v34, 0.0  ;;  %v726_v44 = vmax.f32 %v634_v35, 0.0  ;;  %v509_v45 = vadd.f32 %v944_v41, %v1200_v38  ;;  %v637_v46 = vadd.f32 %v976_v42, %v1200_v38  ;;  %v500_v47 = vpop.f32.mrb[23].mxu0  ;;  %v628_v48 = vpop.f32.mrb[23].mxu1 }
 0x115   :  { %v692_v49 = vmax.f32 %v498_v39, 0.0  ;;  %v724_v50 = vmax.f32 %v626_v40, 0.0  ;;  %v501_v51 = vadd.f32 %v1200_v38, %v500_v47  ;;  %v629_v52 = vadd.f32 %v1200_v38, %v628_v48 }
 0x116   :  { %758 = vst [vmem:[%s1461_s3 + $0xb0] sm:$0xff] %v694_v43  ;;  %790 = vst [vmem:[%s1461_s3 + $0x1b0] sm:$0xff] %v726_v44  ;;  %v695_v53 = vmax.f32 %v509_v45, 0.0  ;;  %v727_v54 = vmax.f32 %v637_v46, 0.0 }
 0x117   :  { %756 = vst [vmem:[%s1461_s3 + $0xa0] sm:$0xff] %v692_v49  ;;  %788 = vst [vmem:[%s1461_s3 + $0x1a0] sm:$0xff] %v724_v50  ;;  %v693_v55 = vmax.f32 %v501_v51, 0.0  ;;  %v725_v56 = vmax.f32 %v629_v52, 0.0 }
 0x118   :  { %759 = vst [vmem:[%s1461_s3 + $0xb8] sm:$0xff] %v695_v53  ;;  %791 = vst [vmem:[%s1461_s3 + $0x1b8] sm:$0xff] %v727_v54 }
 0x119   :  { %757 = vst [vmem:[%s1461_s3 + $0xa8] sm:$0xff] %v693_v55  ;;  %789 = vst [vmem:[%s1461_s3 + $0x1a8] sm:$0xff] %v725_v56  ;;  %v947_v57 = vpop.f32.mrb[24].mxu0  ;;  %v979_v58 = vpop.f32.mrb[24].mxu1 }
 0x11a   :  { %v522_v59 = vadd.f32 %v947_v57, %v1200_v38  ;;  %v650_v60 = vadd.f32 %v979_v58, %v1200_v38  ;;  %v513_v61 = vpop.f32.mrb[25].mxu0  ;;  %v641_v62 = vpop.f32.mrb[25].mxu1 }
 0x11b   :  { %v514_v63 = vadd.f32 %v1200_v38, %v513_v61  ;;  %v642_v0 = vadd.f32 %v1200_v38, %v641_v62  ;;  %v948_v1 = vpop.f32.mrb[26].mxu0  ;;  %v980_v2 = vpop.f32.mrb[26].mxu1 }
 0x11c   :  { %v698_v3 = vmax.f32 %v522_v59, 0.0  ;;  %v730_v4 = vmax.f32 %v650_v60, 0.0  ;;  %v525_v5 = vadd.f32 %v948_v1, %v1200_v38  ;;  %v653_v6 = vadd.f32 %v980_v2, %v1200_v38  ;;  %v516_v7 = vpop.f32.mrb[27].mxu0  ;;  %v644_v8 = vpop.f32.mrb[27].mxu1 }
 0x11d   :  { %v696_v9 = vmax.f32 %v514_v63, 0.0  ;;  %v728_v10 = vmax.f32 %v642_v0, 0.0  ;;  %v517_v11 = vadd.f32 %v1200_v38, %v516_v7  ;;  %v645_v12 = vadd.f32 %v1200_v38, %v644_v8 }
 0x11e   :  { %762 = vst [vmem:[%s1461_s3 + $0xd0] sm:$0xff] %v698_v3  ;;  %794 = vst [vmem:[%s1461_s3 + $0x1d0] sm:$0xff] %v730_v4  ;;  %v699_v13 = vmax.f32 %v525_v5, 0.0  ;;  %v731_v14 = vmax.f32 %v653_v6, 0.0 }
 0x11f   :  { %760 = vst [vmem:[%s1461_s3 + $0xc0] sm:$0xff] %v696_v9  ;;  %792 = vst [vmem:[%s1461_s3 + $0x1c0] sm:$0xff] %v728_v10  ;;  %v697_v15 = vmax.f32 %v517_v11, 0.0  ;;  %v729_v16 = vmax.f32 %v645_v12, 0.0 }
 0x120   :  { %763 = vst [vmem:[%s1461_s3 + $0xd8] sm:$0xff] %v699_v13  ;;  %795 = vst [vmem:[%s1461_s3 + $0x1d8] sm:$0xff] %v731_v14 }
 0x121   :  { %761 = vst [vmem:[%s1461_s3 + $0xc8] sm:$0xff] %v697_v15  ;;  %793 = vst [vmem:[%s1461_s3 + $0x1c8] sm:$0xff] %v729_v16  ;;  %v951_v17 = vpop.f32.mrb[28].mxu0  ;;  %v983_v18 = vpop.f32.mrb[28].mxu1 }
 0x122   :  { %v538_v19 = vadd.f32 %v951_v17, %v1200_v38  ;;  %v666_v20 = vadd.f32 %v983_v18, %v1200_v38  ;;  %v529_v21 = vpop.f32.mrb[29].mxu0  ;;  %v657_v22 = vpop.f32.mrb[29].mxu1 }
 0x123   :  { %v530_v23 = vadd.f32 %v1200_v38, %v529_v21  ;;  %v658_v24 = vadd.f32 %v1200_v38, %v657_v22  ;;  %v952_v25 = vpop.f32.mrb[30].mxu0  ;;  %v984_v26 = vpop.f32.mrb[30].mxu1 }
 0x124   :  { %v702_v27 = vmax.f32 %v538_v19, 0.0  ;;  %v734_v28 = vmax.f32 %v666_v20, 0.0  ;;  %v541_v29 = vadd.f32 %v952_v25, %v1200_v38  ;;  %v669_v30 = vadd.f32 %v984_v26, %v1200_v38  ;;  %v532_v31 = vpop.f32.mrb[31].mxu0  ;;  %v660_v32 = vpop.f32.mrb[31].mxu1 }
 0x125   :  { %v700_v33 = vmax.f32 %v530_v23, 0.0  ;;  %v732_v34 = vmax.f32 %v658_v24, 0.0  ;;  %v533_v35 = vadd.f32 %v1200_v38, %v532_v31  ;;  %v661_v36 = vadd.f32 %v1200_v38, %v660_v32 }
 0x126   :  { %766 = vst [vmem:[%s1461_s3 + $0xf0] sm:$0xff] %v702_v27  ;;  %798 = vst [vmem:[%s1461_s3 + $0x1f0] sm:$0xff] %v734_v28  ;;  %v703_v37 = vmax.f32 %v541_v29, 0.0  ;;  %v735_v39 = vmax.f32 %v669_v30, 0.0 }
 0x127   :  { %764 = vst [vmem:[%s1461_s3 + $0xe0] sm:$0xff] %v700_v33  ;;  %796 = vst [vmem:[%s1461_s3 + $0x1e0] sm:$0xff] %v732_v34  ;;  %v701_v40 = vmax.f32 %v533_v35, 0.0  ;;  %v733_v38 = vmax.f32 %v661_v36, 0.0 }
 0x128   :  { %767 = vst [vmem:[%s1461_s3 + $0xf8] sm:$0xff] %v703_v37  ;;  %799 = vst [vmem:[%s1461_s3 + $0x1f8] sm:$0xff] %v735_v39 }
 0x129   :  { %765 = vst [vmem:[%s1461_s3 + $0xe8] sm:$0xff] %v701_v40  ;;  %797 = vst [vmem:[%s1461_s3 + $0x1e8] sm:$0xff] %v733_v38 }

// kernel: _forward_impl.8
= control target key start
LH: loop header
LB: loop body
LE: loop exit
PB: predicated region body
PF: predicated region fallthrough
CT: control target
= control target key end

     0   :  { %vm114_vm0 = vcmask 588800   ;;  %vm139_vm1 = vcmask 1043456   ;;  %s480_s1 = inlined_call_operand.vmem [shape: bf16[72,128], index: 1, kind: input, shape index: {}]   ;;  %s481_s0 = inlined_call_operand.vmem [shape: bf16[128,72], index: 0, kind: input, shape index: {}]   ;;  %s482_s2 = inlined_call_operand.vmem [shape: f32[1,128], index: 2, kind: input, shape index: {}]   ;;  %s483_s3 = inlined_call_operand.vmem [shape: f32[128,128], index: 3, kind: output, shape index: {}]  }
   0x1   :  { %v349_v0 = vld [vmem:[%s480_s1] sm:$0xff]   ;;  %v350_v1 = vld [vmem:[%s480_s1 + $0x8] sm:$0xff]   ;;  %v351_v2 = vld [vmem:[%s480_s1 + $0x10] sm:$0xff]  }
   0x2   :  { %311 = vmatprep.subr.bf16.mxu0 %v349_v0  ;;  %337 = vmatprep.subr.bf16.mxu1 %v349_v0  ;;  %v354_v3 = vld [vmem:[%s481_s0] sm:$0xff]   ;;  %v352_v5 = vld [vmem:[%s480_s1 + $0x18] sm:$0xff]   ;;  %v356_v8 = vld [vmem:[%s481_s0 + $0x8] sm:$0xff]  }
   0x3   :  { %312 = vmatpush3.bf16.msra.mxu0 %v349_v0  ;;  %342 = vmatpush3.bf16.msra.mxu1 %v349_v0  ;;  %v355_v4 = vld [vmem:[%s481_s0 + $0x20] sm:$0xff]   ;;  %v357_v9 = vld [vmem:[%s481_s0 + $0x28] sm:$0xff]   ;;  %v358_v10 = vld [vmem:[%s481_s0 + $0x10] sm:$0xff]  }
   0x4   :  { %313 = vmatprep.subr.bf16.mxu0 %v350_v1  ;;  %338 = vmatprep.subr.bf16.mxu1 %v350_v1  ;;  %v353_v6 = vld [vmem:[%s480_s1 + $0x20] ss:$0 sps:$4 sm:$0xff]   ;;  %v359_v11 = vld [vmem:[%s481_s0 + $0x30] sm:$0xff]   ;;  %v360_v12 = vld [vmem:[%s481_s0 + $0x18] sm:$0xff]  }
   0x5   :  { %321 = vmatprep.mubr.msk.bf16.mxu0 %vm114_vm0, %v354_v3  ;;  %329 = vmatprep.mubr.msk.bf16.mxu1 %vm114_vm0, %v355_v4  ;;  %v141_v7 = vsel %vm139_vm1, %v353_v6, 0  ;;  %v361_v13 = vld [vmem:[%s481_s0 + $0x38] sm:$0xff]   ;;  %v276_v14 = vld [vmem:[%s482_s2] ss:$0 sm:$0xff] }
   0x7   :  { %314 = vmatpush3.bf16.msra.mxu0 %v350_v1  ;;  %343 = vmatpush3.bf16.msra.mxu1 %v350_v1 }
   0x8   :  { %315 = vmatprep.subr.bf16.mxu0 %v351_v2  ;;  %339 = vmatprep.subr.bf16.mxu1 %v351_v2 }
   0xb   :  { %316 = vmatpush3.bf16.msra.mxu0 %v351_v2  ;;  %344 = vmatpush3.bf16.msra.mxu1 %v351_v2 }
   0xc   :  { %317 = vmatprep.subr.bf16.mxu0 %v352_v5  ;;  %340 = vmatprep.subr.bf16.mxu1 %v352_v5 }
   0xf   :  { %318 = vmatpush3.bf16.msra.mxu0 %v352_v5  ;;  %345 = vmatpush3.bf16.msra.mxu1 %v352_v5 }
  0x10   :  { %347 = vmatprep.subr.msk.bf16.mxu0 %vm139_vm1, %v353_v6  ;;  %348 = vmatprep.subr.msk.bf16.mxu1 %vm139_vm1, %v353_v6 }
  0x13   :  { %320 = vmatpush3.bf16.msra.mxu0 %v141_v7  ;;  %346 = vmatpush3.bf16.msra.mxu1 %v141_v7 }
  0x16   :  { %322 = vmatmul.mubr.msk.bf16.vlgmr.msra.gmra.mrb[0].mxu0 %vm114_vm0, %v356_v8  ;;  %330 = vmatmul.mubr.msk.bf16.vlgmr.msra.gmra.mrb[0].mxu1 %vm114_vm0, %v357_v9 }
  0x17   :  { %325 = vmatprep.mubr.msk.bf16.mxu0 %vm114_vm0, %v358_v10  ;;  %333 = vmatprep.mubr.msk.bf16.mxu1 %vm114_vm0, %v359_v11 }
  0x1e   :  { %326 = vmatmul.mubr.msk.bf16.gmra.mrb[4].mxu0 %vm114_vm0, %v360_v12  ;;  %334 = vmatmul.mubr.msk.bf16.gmra.mrb[4].mxu1 %vm114_vm0, %v361_v13 }
  0xe9   :  { %v323_v15 = vpop.f32.mrb[0].mxu0  ;;  %v331_v16 = vpop.f32.mrb[0].mxu1 }
  0xea   :  { %v186_v17 = vadd.f32 %v323_v15, %v276_v14  ;;  %v218_v18 = vadd.f32 %v331_v16, %v276_v14  ;;  %v177_v19 = vpop.f32.mrb[1].mxu0  ;;  %v209_v20 = vpop.f32.mrb[1].mxu1 }
  0xeb   :  { %v178_v21 = vadd.f32 %v276_v14, %v177_v19  ;;  %v210_v22 = vadd.f32 %v276_v14, %v209_v20  ;;  %v324_v23 = vpop.f32.mrb[2].mxu0  ;;  %v332_v24 = vpop.f32.mrb[2].mxu1 }
  0xec   :  { %v242_v25 = vmax.f32 %v186_v17, 0.0  ;;  %v250_v26 = vmax.f32 %v218_v18, 0.0  ;;  %v189_v27 = vadd.f32 %v324_v23, %v276_v14  ;;  %v221_v28 = vadd.f32 %v332_v24, %v276_v14  ;;  %v180_v29 = vpop.f32.mrb[3].mxu0  ;;  %v212_v30 = vpop.f32.mrb[3].mxu1 }
  0xed   :  { %v240_v31 = vmax.f32 %v178_v21, 0.0  ;;  %v248_v32 = vmax.f32 %v210_v22, 0.0  ;;  %v181_v33 = vadd.f32 %v276_v14, %v180_v29  ;;  %v213_v34 = vadd.f32 %v276_v14, %v212_v30 }
  0xee   :  { %258 = vst [vmem:[%s483_s3 + $0x10] sm:$0xff] %v242_v25  ;;  %266 = vst [vmem:[%s483_s3 + $0x50] sm:$0xff] %v250_v26  ;;  %v243_v35 = vmax.f32 %v189_v27, 0.0  ;;  %v251_v36 = vmax.f32 %v221_v28, 0.0 }
  0xef   :  { %256 = vst [vmem:[%s483_s3] sm:$0xff] %v240_v31  ;;  %264 = vst [vmem:[%s483_s3 + $0x40] sm:$0xff] %v248_v32  ;;  %v241_v37 = vmax.f32 %v181_v33, 0.0  ;;  %v249_v38 = vmax.f32 %v213_v34, 0.0 }
  0xf0   :  { %259 = vst [vmem:[%s483_s3 + $0x18] sm:$0xff] %v243_v35  ;;  %267 = vst [vmem:[%s483_s3 + $0x58] sm:$0xff] %v251_v36 }
  0xf1   :  { %257 = vst [vmem:[%s483_s3 + $0x8] sm:$0xff] %v241_v37  ;;  %265 = vst [vmem:[%s483_s3 + $0x48] sm:$0xff] %v249_v38  ;;  %v327_v39 = vpop.f32.mrb[4].mxu0  ;;  %v335_v40 = vpop.f32.mrb[4].mxu1 }
  0xf2   :  { %v202_v41 = vadd.f32 %v327_v39, %v276_v14  ;;  %v234_v42 = vadd.f32 %v335_v40, %v276_v14  ;;  %v193_v43 = vpop.f32.mrb[5].mxu0  ;;  %v225_v44 = vpop.f32.mrb[5].mxu1 }
  0xf3   :  { %v194_v45 = vadd.f32 %v276_v14, %v193_v43  ;;  %v226_v46 = vadd.f32 %v276_v14, %v225_v44  ;;  %v328_v47 = vpop.f32.mrb[6].mxu0  ;;  %v336_v48 = vpop.f32.mrb[6].mxu1 }
  0xf4   :  { %v246_v49 = vmax.f32 %v202_v41, 0.0  ;;  %v254_v50 = vmax.f32 %v234_v42, 0.0  ;;  %v205_v51 = vadd.f32 %v328_v47, %v276_v14  ;;  %v237_v52 = vadd.f32 %v336_v48, %v276_v14  ;;  %v196_v53 = vpop.f32.mrb[7].mxu0  ;;  %v228_v54 = vpop.f32.mrb[7].mxu1 }
  0xf5   :  { %v244_v55 = vmax.f32 %v194_v45, 0.0  ;;  %v252_v56 = vmax.f32 %v226_v46, 0.0  ;;  %v197_v57 = vadd.f32 %v276_v14, %v196_v53  ;;  %v229_v58 = vadd.f32 %v276_v14, %v228_v54 }
  0xf6   :  { %262 = vst [vmem:[%s483_s3 + $0x30] sm:$0xff] %v246_v49  ;;  %270 = vst [vmem:[%s483_s3 + $0x70] sm:$0xff] %v254_v50  ;;  %v247_v59 = vmax.f32 %v205_v51, 0.0  ;;  %v255_v60 = vmax.f32 %v237_v52, 0.0 }
  0xf7   :  { %260 = vst [vmem:[%s483_s3 + $0x20] sm:$0xff] %v244_v55  ;;  %268 = vst [vmem:[%s483_s3 + $0x60] sm:$0xff] %v252_v56  ;;  %v245_v61 = vmax.f32 %v197_v57, 0.0  ;;  %v253_v62 = vmax.f32 %v229_v58, 0.0 }
  0xf8   :  { %263 = vst [vmem:[%s483_s3 + $0x38] sm:$0xff] %v247_v59  ;;  %271 = vst [vmem:[%s483_s3 + $0x78] sm:$0xff] %v255_v60 }
  0xf9   :  { %261 = vst [vmem:[%s483_s3 + $0x28] sm:$0xff] %v245_v61  ;;  %269 = vst [vmem:[%s483_s3 + $0x68] sm:$0xff] %v253_v62 }

// kernel: _forward_impl.9
= control target key start
LH: loop header
LB: loop body
LE: loop exit
PB: predicated region body
PF: predicated region fallthrough
CT: control target
= control target key end

     0   :  { %v426_v0 = vmov 0   ;;  %vm182_vm0 = vcmask 130048   ;;  %s599_s1 = inlined_call_operand.vmem [shape: bf16[144,128], index: 1, kind: input, shape index: {}]   ;;  %s600_s0 = inlined_call_operand.vmem [shape: bf16[128,144], index: 0, kind: input, shape index: {}]   ;;  %s601_s2 = inlined_call_operand.vmem [shape: f32[1,128], index: 2, kind: input, shape index: {}]   ;;  %s602_s3 = inlined_call_operand.vmem [shape: f32[128,128], index: 3, kind: output, shape index: {}]  }
   0x1   :  { %207 = vmatprep.subr.bf16.mxu0 %v426_v0  ;;  %374 = vmatprep.subr.bf16.mxu1 %v426_v0  ;;  %v393_v1 = vld [vmem:[%s599_s1] sm:$0xff]   ;;  %v394_v2 = vld [vmem:[%s599_s1 + $0x8] sm:$0xff]   ;;  %v395_v3 = vld [vmem:[%s599_s1 + $0x10] sm:$0xff]  }
   0x2   :  { %208 = vmatpush1.bf16.msra.mxu0 %v393_v1  ;;  %383 = vmatpush1.bf16.msra.mxu1 %v393_v1  ;;  %v396_v4 = vld [vmem:[%s599_s1 + $0x18] sm:$0xff]   ;;  %v404_v5 = vld [vmem:[%s600_s0 + $0x4] ss:$8 sps:$4 sm:$0xff]   ;;  %v399_v9 = vld [vmem:[%s599_s1 + $0x30] sm:$0xff]  }
   0x3   :  { %209 = vmatprep.subr.bf16.mxu0 %v426_v0  ;;  %375 = vmatprep.subr.bf16.mxu1 %v426_v0  ;;  %v407_v6 = vld [vmem:[%s600_s0 + $0x44] ss:$8 sps:$4 sm:$0xff]   ;;  %v400_v10 = vld [vmem:[%s599_s1 + $0x38] sm:$0xff]   ;;  %v402_v12 = vld [vmem:[%s600_s0] ss:$8 sps:$4 sm:$0xff]  }
   0x4   :  { %366 = vmatprep.mubr.msk.bf16.mxu0 %vm182_vm0, %v404_v5  ;;  %370 = vmatprep.mubr.msk.bf16.mxu1 %vm182_vm0, %v407_v6  ;;  %v397_v7 = vld [vmem:[%s599_s1 + $0x20] sm:$0xff]   ;;  %v398_v8 = vld [vmem:[%s599_s1 + $0x28] sm:$0xff]   ;;  %v408_v14 = vld [vmem:[%s600_s0 + $0x14] ss:$8 sps:$4 sm:$0xff]  }
   0x5   :  { %v401_v11 = vld [vmem:[%s599_s1 + $0x40] sm:$0xff]   ;;  %v410_v15 = vld [vmem:[%s600_s0 + $0x54] ss:$8 sps:$4 sm:$0xff]   ;;  %v412_v16 = vld [vmem:[%s600_s0 + $0x10] ss:$8 sps:$4 sm:$0xff]  }
   0x6   :  { %210 = vmatpush1.bf16.msra.mxu0 %v394_v2  ;;  %384 = vmatpush1.bf16.msra.mxu1 %v394_v2  ;;  %v405_v13 = vld [vmem:[%s600_s0 + $0x40] ss:$8 sps:$4 sm:$0xff]   ;;  %v413_v17 = vld [vmem:[%s600_s0 + $0x50] ss:$8 sps:$4 sm:$0xff]   ;;  %v414_v18 = vld [vmem:[%s600_s0 + $0x24] ss:$8 sps:$4 sm:$0xff]  }
   0x7   :  { %211 = vmatprep.subr.bf16.mxu0 %v426_v0  ;;  %376 = vmatprep.subr.bf16.mxu1 %v426_v0  ;;  %v416_v19 = vld [vmem:[%s600_s0 + $0x64] ss:$8 sps:$4 sm:$0xff]   ;;  %v418_v20 = vld [vmem:[%s600_s0 + $0x20] ss:$8 sps:$4 sm:$0xff]   ;;  %v420_v22 = vld [vmem:[%s600_s0 + $0x34] ss:$8 sps:$4 sm:$0xff]  }
   0x8   :  { %v419_v21 = vld [vmem:[%s600_s0 + $0x60] ss:$8 sps:$4 sm:$0xff]   ;;  %v422_v23 = vld [vmem:[%s600_s0 + $0x74] ss:$8 sps:$4 sm:$0xff]   ;;  %v424_v24 = vld [vmem:[%s600_s0 + $0x30] ss:$8 sps:$4 sm:$0xff]  }
   0x9   :  { %v425_v25 = vld [vmem:[%s600_s0 + $0x70] ss:$8 sps:$4 sm:$0xff]   ;;  %v533_v26 = vld [vmem:[%s601_s2] ss:$0 sm:$0xff] }
   0xa   :  { %212 = vmatpush1.bf16.msra.mxu0 %v395_v3  ;;  %385 = vmatpush1.bf16.msra.mxu1 %v395_v3 }
   0xb   :  { %213 = vmatprep.subr.bf16.mxu0 %v426_v0  ;;  %377 = vmatprep.subr.bf16.mxu1 %v426_v0 }
   0xe   :  { %214 = vmatpush1.bf16.msra.mxu0 %v396_v4  ;;  %386 = vmatpush1.bf16.msra.mxu1 %v396_v4 }
   0xf   :  { %215 = vmatprep.subr.bf16.mxu0 %v426_v0  ;;  %378 = vmatprep.subr.bf16.mxu1 %v426_v0 }
  0x12   :  { %216 = vmatpush1.bf16.msra.mxu0 %v397_v7  ;;  %387 = vmatpush1.bf16.msra.mxu1 %v397_v7 }
  0x13   :  { %217 = vmatprep.subr.bf16.mxu0 %v426_v0  ;;  %379 = vmatprep.subr.bf16.mxu1 %v426_v0 }
  0x16   :  { %218 = vmatpush1.bf16.msra.mxu0 %v398_v8  ;;  %388 = vmatpush1.bf16.msra.mxu1 %v398_v8 }
  0x17   :  { %219 = vmatprep.subr.bf16.mxu0 %v426_v0  ;;  %380 = vmatprep.subr.bf16.mxu1 %v426_v0 }
  0x1a   :  { %220 = vmatpush1.bf16.msra.mxu0 %v399_v9  ;;  %389 = vmatpush1.bf16.msra.mxu1 %v399_v9 }
  0x1b   :  { %221 = vmatprep.subr.bf16.mxu0 %v426_v0  ;;  %381 = vmatprep.subr.bf16.mxu1 %v426_v0 }
  0x1e   :  { %222 = vmatpush1.bf16.msra.mxu0 %v400_v10  ;;  %390 = vmatpush1.bf16.msra.mxu1 %v400_v10 }
  0x1f   :  { %223 = vmatprep.subr.bf16.mxu0 %v426_v0  ;;  %382 = vmatprep.subr.bf16.mxu1 %v426_v0 }
  0x22   :  { %224 = vmatpush1.bf16.msra.mxu0 %v401_v11  ;;  %391 = vmatpush1.bf16.msra.mxu1 %v401_v11 }
  0x25   :  { %240 = vmatmul.mubr.bf16.vlgmr.msra.gmra.mrb[0].mxu0 %v402_v12  ;;  %272 = vmatmul.mubr.bf16.vlgmr.msra.gmra.mrb[0].mxu1 %v405_v13 }
  0x26   :  { %367 = vmatprep.mubr.msk.bf16.mxu0 %vm182_vm0, %v408_v14  ;;  %371 = vmatprep.mubr.msk.bf16.mxu1 %vm182_vm0, %v410_v15 }
  0x2d   :  { %248 = vmatmul.mubr.bf16.gmra.mrb[4].mxu0 %v412_v16  ;;  %280 = vmatmul.mubr.bf16.gmra.mrb[4].mxu1 %v413_v17 }
  0x2e   :  { %368 = vmatprep.mubr.msk.bf16.mxu0 %vm182_vm0, %v414_v18  ;;  %372 = vmatprep.mubr.msk.bf16.mxu1 %vm182_vm0, %v416_v19 }
  0x35   :  { %256 = vmatmul.mubr.bf16.gmra.mrb[8].mxu0 %v418_v20  ;;  %288 = vmatmul.mubr.bf16.gmra.mrb[8].mxu1 %v419_v21 }
  0x36   :  { %369 = vmatprep.mubr.msk.bf16.mxu0 %vm182_vm0, %v420_v22  ;;  %373 = vmatprep.mubr.msk.bf16.mxu1 %vm182_vm0, %v422_v23 }
  0x3d   :  { %264 = vmatmul.mubr.bf16.gmra.mrb[12].mxu0 %v424_v24  ;;  %296 = vmatmul.mubr.bf16.gmra.mrb[12].mxu1 %v425_v25 }
  0xf8   :  { %v241_v27 = vpop.f32.mrb[0].mxu0  ;;  %v273_v28 = vpop.f32.mrb[0].mxu1 }
  0xf9   :  { %v242_v29 = vadd.f32 %v533_v26, %v241_v27  ;;  %v274_v30 = vadd.f32 %v533_v26, %v273_v28  ;;  %v243_v31 = vpop.f32.mrb[1].mxu0  ;;  %v275_v32 = vpop.f32.mrb[1].mxu1 }
  0xfa   :  { %v244_v33 = vpop.f32.mrb[2].mxu0  ;;  %v276_v34 = vpop.f32.mrb[2].mxu1 }
  0xfb   :  { %v304_v35 = vmax.f32 %v242_v29, 0.0  ;;  %v312_v36 = vmax.f32 %v274_v30, 0.0  ;;  %v245_v37 = vadd.f32 %v533_v26, %v244_v33  ;;  %v277_v38 = vadd.f32 %v533_v26, %v276_v34  ;;  %v246_v39 = vpop.f32.mrb[3].mxu0  ;;  %v278_v40 = vpop.f32.mrb[3].mxu1 }
  0xfd   :  { %320 = vst [vmem:[%s602_s3] sm:$0xff] %v304_v35  ;;  %328 = vst [vmem:[%s602_s3 + $0x40] sm:$0xff] %v312_v36  ;;  %v305_v41 = vmax.f32 %v245_v37, 0.0  ;;  %v313_v42 = vmax.f32 %v277_v38, 0.0 }
  0xff   :  { %321 = vst [vmem:[%s602_s3 + $0x8] sm:$0xff] %v305_v41  ;;  %329 = vst [vmem:[%s602_s3 + $0x48] sm:$0xff] %v313_v42 }
 0x100   :  { %v249_v43 = vpop.f32.mrb[4].mxu0  ;;  %v281_v44 = vpop.f32.mrb[4].mxu1 }
 0x101   :  { %v250_v45 = vadd.f32 %v533_v26, %v249_v43  ;;  %v282_v46 = vadd.f32 %v533_v26, %v281_v44  ;;  %v251_v47 = vpop.f32.mrb[5].mxu0  ;;  %v283_v48 = vpop.f32.mrb[5].mxu1 }
 0x102   :  { %v252_v49 = vpop.f32.mrb[6].mxu0  ;;  %v284_v50 = vpop.f32.mrb[6].mxu1 }
 0x103   :  { %v306_v51 = vmax.f32 %v250_v45, 0.0  ;;  %v314_v52 = vmax.f32 %v282_v46, 0.0  ;;  %v253_v53 = vadd.f32 %v533_v26, %v252_v49  ;;  %v285_v54 = vadd.f32 %v533_v26, %v284_v50  ;;  %v254_v55 = vpop.f32.mrb[7].mxu0  ;;  %v286_v56 = vpop.f32.mrb[7].mxu1 }
 0x105   :  { %322 = vst [vmem:[%s602_s3 + $0x10] sm:$0xff] %v306_v51  ;;  %330 = vst [vmem:[%s602_s3 + $0x50] sm:$0xff] %v314_v52  ;;  %v307_v57 = vmax.f32 %v253_v53, 0.0  ;;  %v315_v58 = vmax.f32 %v285_v54, 0.0 }
 0x107   :  { %323 = vst [vmem:[%s602_s3 + $0x18] sm:$0xff] %v307_v57  ;;  %331 = vst [vmem:[%s602_s3 + $0x58] sm:$0xff] %v315_v58 }
 0x108   :  { %v257_v59 = vpop.f32.mrb[8].mxu0  ;;  %v289_v60 = vpop.f32.mrb[8].mxu1 }
 0x109   :  { %v258_v61 = vadd.f32 %v533_v26, %v257_v59  ;;  %v290_v62 = vadd.f32 %v533_v26, %v289_v60  ;;  %v259_v63 = vpop.f32.mrb[9].mxu0  ;;  %v291_v0 = vpop.f32.mrb[9].mxu1 }
 0x10a   :  { %v260_v1 = vpop.f32.mrb[10].mxu0  ;;  %v292_v2 = vpop.f32.mrb[10].mxu1 }
 0x10b   :  { %v308_v3 = vmax.f32 %v258_v61, 0.0  ;;  %v316_v4 = vmax.f32 %v290_v62, 0.0  ;;  %v261_v5 = vadd.f32 %v533_v26, %v260_v1  ;;  %v293_v6 = vadd.f32 %v533_v26, %v292_v2  ;;  %v262_v7 = vpop.f32.mrb[11].mxu0  ;;  %v294_v8 = vpop.f32.mrb[11].mxu1 }
 0x10d   :  { %324 = vst [vmem:[%s602_s3 + $0x20] sm:$0xff] %v308_v3  ;;  %332 = vst [vmem:[%s602_s3 + $0x60] sm:$0xff] %v316_v4  ;;  %v309_v9 = vmax.f32 %v261_v5, 0.0  ;;  %v317_v10 = vmax.f32 %v293_v6, 0.0 }
 0x10f   :  { %325 = vst [vmem:[%s602_s3 + $0x28] sm:$0xff] %v309_v9  ;;  %333 = vst [vmem:[%s602_s3 + $0x68] sm:$0xff] %v317_v10 }
 0x110   :  { %v265_v11 = vpop.f32.mrb[12].mxu0  ;;  %v297_v12 = vpop.f32.mrb[12].mxu1 }
 0x111   :  { %v266_v13 = vadd.f32 %v533_v26, %v265_v11  ;;  %v298_v14 = vadd.f32 %v533_v26, %v297_v12  ;;  %v267_v15 = vpop.f32.mrb[13].mxu0  ;;  %v299_v16 = vpop.f32.mrb[13].mxu1 }
 0x112   :  { %v268_v17 = vpop.f32.mrb[14].mxu0  ;;  %v300_v18 = vpop.f32.mrb[14].mxu1 }
 0x113   :  { %v310_v19 = vmax.f32 %v266_v13, 0.0  ;;  %v318_v20 = vmax.f32 %v298_v14, 0.0  ;;  %v269_v21 = vadd.f32 %v533_v26, %v268_v17  ;;  %v301_v22 = vadd.f32 %v533_v26, %v300_v18  ;;  %v270_v23 = vpop.f32.mrb[15].mxu0  ;;  %v302_v24 = vpop.f32.mrb[15].mxu1 }
 0x115   :  { %326 = vst [vmem:[%s602_s3 + $0x30] sm:$0xff] %v310_v19  ;;  %334 = vst [vmem:[%s602_s3 + $0x70] sm:$0xff] %v318_v20  ;;  %v311_v25 = vmax.f32 %v269_v21, 0.0  ;;  %v319_v27 = vmax.f32 %v301_v22, 0.0 }
 0x117   :  { %327 = vst [vmem:[%s602_s3 + $0x38] sm:$0xff] %v311_v25  ;;  %335 = vst [vmem:[%s602_s3 + $0x78] sm:$0xff] %v319_v27 }

// kernel: _forward_impl.10
= control target key start
LH: loop header
LB: loop body
LE: loop exit
PB: predicated region body
PF: predicated region fallthrough
CT: control target
= control target key end

     0   :  { %v234_v0 = vmov 0   ;;  %vm116_vm0 = vcmask 130048   ;;  %s309_s1 = inlined_call_operand.vmem [shape: bf16[144,128], index: 1, kind: input, shape index: {}]   ;;  %s310_s0 = inlined_call_operand.vmem [shape: bf16[32,144], index: 0, kind: input, shape index: {}]   ;;  %s311_s2 = inlined_call_operand.vmem [shape: f32[1,128], index: 2, kind: input, shape index: {}]   ;;  %s312_s3 = inlined_call_operand.vmem [shape: f32[32,128], index: 3, kind: output, shape index: {}]  }
   0x1   :  { %123 = vmatprep.subr.bf16.mxu0 %v234_v0  ;;  %200 = vmatprep.subr.bf16.mxu1 %v234_v0  ;;  %v219_v1 = vld [vmem:[%s309_s1] sm:$0xff]   ;;  %v220_v2 = vld [vmem:[%s309_s1 + $0x8] sm:$0xff]   ;;  %v221_v3 = vld [vmem:[%s309_s1 + $0x10] sm:$0xff]  }
   0x2   :  { %124 = vmatpush1.bf16.msra.mxu0 %v219_v1  ;;  %209 = vmatpush1.bf16.msra.mxu1 %v219_v1  ;;  %v222_v4 = vld [vmem:[%s309_s1 + $0x18] sm:$0xff]   ;;  %v230_v5 = vld [vmem:[%s310_s0 + $0x4] ss:$8 sps:$4 sm:$0xff]   ;;  %v225_v9 = vld [vmem:[%s309_s1 + $0x30] sm:$0xff]  }
   0x3   :  { %125 = vmatprep.subr.bf16.mxu0 %v234_v0  ;;  %201 = vmatprep.subr.bf16.mxu1 %v234_v0  ;;  %v233_v6 = vld [vmem:[%s310_s0 + $0x14] ss:$8 sps:$4 sm:$0xff]   ;;  %v223_v7 = vld [vmem:[%s309_s1 + $0x20] sm:$0xff]   ;;  %v224_v8 = vld [vmem:[%s309_s1 + $0x28] sm:$0xff]  }
   0x4   :  { %198 = vmatprep.mubr.msk.bf16.mxu0 %vm116_vm0, %v230_v5  ;;  %199 = vmatprep.mubr.msk.bf16.mxu1 %vm116_vm0, %v233_v6  ;;  %v226_v10 = vld [vmem:[%s309_s1 + $0x38] sm:$0xff]   ;;  %v227_v11 = vld [vmem:[%s309_s1 + $0x40] sm:$0xff]  }
   0x5   :  { %v228_v12 = vld [vmem:[%s310_s0] ss:$8 sps:$4 sm:$0xff]   ;;  %v231_v13 = vld [vmem:[%s310_s0 + $0x10] ss:$8 sps:$4 sm:$0xff]  }
   0x6   :  { %126 = vmatpush1.bf16.msra.mxu0 %v220_v2  ;;  %210 = vmatpush1.bf16.msra.mxu1 %v220_v2  ;;  %v184_v14 = vld [vmem:[%s311_s2] ss:$0 sm:$0xff] }
   0x7   :  { %127 = vmatprep.subr.bf16.mxu0 %v234_v0  ;;  %202 = vmatprep.subr.bf16.mxu1 %v234_v0 }
   0xa   :  { %128 = vmatpush1.bf16.msra.mxu0 %v221_v3  ;;  %211 = vmatpush1.bf16.msra.mxu1 %v221_v3 }
   0xb   :  { %129 = vmatprep.subr.bf16.mxu0 %v234_v0  ;;  %203 = vmatprep.subr.bf16.mxu1 %v234_v0 }
   0xe   :  { %130 = vmatpush1.bf16.msra.mxu0 %v222_v4  ;;  %212 = vmatpush1.bf16.msra.mxu1 %v222_v4 }
   0xf   :  { %131 = vmatprep.subr.bf16.mxu0 %v234_v0  ;;  %204 = vmatprep.subr.bf16.mxu1 %v234_v0 }
  0x12   :  { %132 = vmatpush1.bf16.msra.mxu0 %v223_v7  ;;  %213 = vmatpush1.bf16.msra.mxu1 %v223_v7 }
  0x13   :  { %133 = vmatprep.subr.bf16.mxu0 %v234_v0  ;;  %205 = vmatprep.subr.bf16.mxu1 %v234_v0 }
  0x16   :  { %134 = vmatpush1.bf16.msra.mxu0 %v224_v8  ;;  %214 = vmatpush1.bf16.msra.mxu1 %v224_v8 }
  0x17   :  { %135 = vmatprep.subr.bf16.mxu0 %v234_v0  ;;  %206 = vmatprep.subr.bf16.mxu1 %v234_v0 }
  0x1a   :  { %136 = vmatpush1.bf16.msra.mxu0 %v225_v9  ;;  %215 = vmatpush1.bf16.msra.mxu1 %v225_v9 }
  0x1b   :  { %137 = vmatprep.subr.bf16.mxu0 %v234_v0  ;;  %207 = vmatprep.subr.bf16.mxu1 %v234_v0 }
  0x1e   :  { %138 = vmatpush1.bf16.msra.mxu0 %v226_v10  ;;  %216 = vmatpush1.bf16.msra.mxu1 %v226_v10 }
  0x1f   :  { %139 = vmatprep.subr.bf16.mxu0 %v234_v0  ;;  %208 = vmatprep.subr.bf16.mxu1 %v234_v0 }
  0x22   :  { %140 = vmatpush1.bf16.msra.mxu0 %v227_v11  ;;  %217 = vmatpush1.bf16.msra.mxu1 %v227_v11 }
  0x25   :  { %156 = vmatmul.mubr.bf16.vlgmr.msra.gmra.mrb[0].mxu0 %v228_v12  ;;  %164 = vmatmul.mubr.bf16.vlgmr.msra.gmra.mrb[0].mxu1 %v231_v13 }
  0xf8   :  { %v157_v15 = vpop.f32.mrb[0].mxu0  ;;  %v165_v16 = vpop.f32.mrb[0].mxu1 }
  0xf9   :  { %v158_v17 = vadd.f32 %v184_v14, %v157_v15  ;;  %v166_v18 = vadd.f32 %v184_v14, %v165_v16  ;;  %v159_v19 = vpop.f32.mrb[1].mxu0  ;;  %v167_v20 = vpop.f32.mrb[1].mxu1 }
  0xfa   :  { %v160_v21 = vpop.f32.mrb[2].mxu0  ;;  %v168_v22 = vpop.f32.mrb[2].mxu1 }
  0xfb   :  { %v172_v23 = vmax.f32 %v158_v17, 0.0  ;;  %v174_v24 = vmax.f32 %v166_v18, 0.0  ;;  %v161_v25 = vadd.f32 %v184_v14, %v160_v21  ;;  %v169_v26 = vadd.f32 %v184_v14, %v168_v22  ;;  %v162_v27 = vpop.f32.mrb[3].mxu0  ;;  %v170_v28 = vpop.f32.mrb[3].mxu1 }
  0xfd   :  { %176 = vst [vmem:[%s312_s3] sm:$0xff] %v172_v23  ;;  %178 = vst [vmem:[%s312_s3 + $0x10] sm:$0xff] %v174_v24  ;;  %v173_v29 = vmax.f32 %v161_v25, 0.0  ;;  %v175_v30 = vmax.f32 %v169_v26, 0.0 }
  0xff   :  { %177 = vst [vmem:[%s312_s3 + $0x8] sm:$0xff] %v173_v29  ;;  %179 = vst [vmem:[%s312_s3 + $0x18] sm:$0xff] %v175_v30 }

// kernel: _forward_impl.11
= control target key start
LH: loop header
LB: loop body
LE: loop exit
PB: predicated region body
PF: predicated region fallthrough
CT: control target
= control target key end

     0   :  { %v383_v2 = vmov 0.0   ;;  %vm384_vm0 = vmmov 0   ;;  %s481_s0 = inlined_call_operand.vmem [shape: bf16[8,288], index: 0, kind: input, shape index: {}]   ;;  %s482_s1 = inlined_call_operand.vmem [shape: bf16[288,128], index: 1, kind: input, shape index: {}]   ;;  %s483_s2 = inlined_call_operand.vmem [shape: f32[1,128], index: 2, kind: input, shape index: {}]   ;;  %s484_s3 = inlined_call_operand.hbm [shape: f32[8,128], index: 3, kind: output, shape index: {}]  }
   0x1   :  { %v338_v0 = vld [vmem:[%s482_s1 + $0x40] sm:$0xff]   ;;  %327 = vmatprep.subr.bf16.mxu1 %v383_v2  ;;  %v340_v3 = vld [vmem:[%s482_s1 + $0x48] sm:$0xff]   ;;  %331 = vmatprep.mubr.msk.bf16.mxu1 %vm384_vm0, %v383_v2  ;;  %v342_v5 = vld [vmem:[%s482_s1 + $0x50] sm:$0xff]  }
   0x2   :  { %v339_v1 = vld [vmem:[%s482_s1] sm:$0xff]   ;;  %302 = vmatprep.subr.bf16.mxu0 %v338_v0  ;;  %v341_v4 = vld [vmem:[%s482_s1 + $0x8] sm:$0xff]   ;;  %v343_v6 = vld [vmem:[%s482_s1 + $0x10] sm:$0xff]  }
   0x3   :  { %303 = vmatpush3.bf16.msra.mxu0 %v339_v1  ;;  %v344_v7 = vld [vmem:[%s482_s1 + $0x58] sm:$0xff]   ;;  %v346_v9 = vld [vmem:[%s482_s1 + $0x60] sm:$0xff]   ;;  %v348_v12 = vld [vmem:[%s482_s1 + $0x68] sm:$0xff]  }
   0x4   :  { %304 = vmatprep.subr.bf16.mxu0 %v340_v3  ;;  %v345_v8 = vld [vmem:[%s482_s1 + $0x18] sm:$0xff]   ;;  %v352_v10 = vld [vmem:[%s482_s1 + $0x80] sm:$0xff]   ;;  %v357_v15 = vld [vmem:[%s482_s1 + $0x88] sm:$0xff]  }
   0x5   :  { %v347_v11 = vld [vmem:[%s482_s1 + $0x20] sm:$0xff]   ;;  %328 = vmatpush3.bf16.msra.mxu1 %v352_v10  ;;  %v349_v16 = vld [vmem:[%s482_s1 + $0x28] sm:$0xff]  }
   0x6   :  { %329 = vmatprep.subr.bf16.mxu1 %v383_v2  ;;  %v16_v13 = vld [vmem:[%s481_s0] sm:$0xff] }
   0x7   :  { %305 = vmatpush3.bf16.msra.mxu0 %v341_v4  ;;  %v281_v14 = vcombine.high %v16_v13, %v16_v13 }
   0x8   :  { %306 = vmatprep.subr.bf16.mxu0 %v342_v5 }
   0xb   :  { %307 = vmatpush3.bf16.msra.mxu0 %v343_v6 }
   0xc   :  { %308 = vmatprep.subr.bf16.mxu0 %v344_v7 }
   0xf   :  { %309 = vmatpush3.bf16.msra.mxu0 %v345_v8 }
  0x10   :  { %310 = vmatprep.subr.bf16.mxu0 %v346_v9 }
  0x13   :  { %311 = vmatpush3.bf16.msra.mxu0 %v347_v11 }
  0x14   :  { %8 = vsyncpa [#allocation3], 0  ;;  %312 = vmatprep.subr.bf16.mxu0 %v348_v12  ;;  %v350_v17 = vld [vmem:[%s482_s1 + $0x70] sm:$0xff]   ;;  %215 = vmatprep.mubr.bf16.mxu0 %v281_v14  ;;  %v358_v18 = vld [vmem:[%s481_s0 + $0x8] ss:$0 sps:$4 sm:$0xff]   ;;  %vm179_vm1 = vcmask 261120   ;;  %v280_v22 = vcombine.low %v16_v13, %v16_v13 }
  0x15   :  { %330 = vmatpush3.bf16.msra.mxu1 %v357_v15  ;;  %v351_v19 = vld [vmem:[%s482_s1 + $0x30] sm:$0xff]   ;;  %v353_v20 = vld [vmem:[%s482_s1 + $0x78] sm:$0xff]   ;;  %v279_v29 = vld [vmem:[%s483_s2] ss:$0 sm:$0xff]  ;;  %s385_s26 = smov [#allocation2]  }
  0x16   :  { %v354_v21 = vld [vmem:[%s482_s1 + $0x38] sm:$0xff]   ;;  %s271_s1 = sshll.u32 %s385_s26, 4  ;;  %s272_s1 = int_to_ptr.vmem [resolvable:$true] %s271_s1 }
  0x17   :  { %313 = vmatpush3.bf16.msra.mxu0 %v349_v16  ;;  %s359_s27 = scalar_lea.vmem %s272_s1, 128  ;;  %p364_p1 = scmp.lt.s32.totalorder %s272_s1, %s272_s1 }
  0x18   :  { %314 = vmatprep.subr.bf16.mxu0 %v350_v17  ;;  %332 = vmatmul.mubr.msk.bf16.vlgmr.msra.gmra.mrb[0].mxu1 %vm179_vm1, %v358_v18  ;;  %p360_p0 = scmp.ne.s32.totalorder %s272_s1, %s359_s27  ;;  %p365_p2 = scmp.lt.s32.totalorder %s359_s27, %s359_s27 }
  0x1a   :  { %p366_p3 = por %p365_p2, %p364_p1 }
  0x1b   :  { %315 = vmatpush3.bf16.msra.mxu0 %v351_v19 }
  0x1c   :  { %316 = vmatprep.subr.bf16.mxu0 %v353_v20  ;;  %p367_p4 = pnand %p366_p3, %p360_p0 }
  0x1f   :  { %317 = vmatpush3.bf16.msra.mxu0 %v354_v21 }
  0x22   :  { %216 = vmatmul.mubr.bf16.vlgmr.msra.gmra.mrb[0].mxu0 %v280_v22 }
  0xeb   :  { %v257_v23 = vpop.f32.mrb[0].mxu1 }
  0xec   :  { %v333_v24 = vpop.f32.mrb[1].mxu1 }
  0xed   :  { %v260_v25 = vpop.f32.mrb[2].mxu1 }
  0xee   :  { %v334_v26 = vpop.f32.mrb[3].mxu1 }
  0xf5   :  { %v318_v27 = vpop.f32.mrb[0].mxu0 }
  0xf6   :  { %v319_v28 = vpop.f32.mrb[1].mxu0 }
  0xf7   :  { %v320_v30 = vadd.f32 %v319_v28, %v318_v27  ;;  %v321_v31 = vpop.f32.mrb[2].mxu0 }
  0xf8   :  { %v322_v32 = vpop.f32.mrb[3].mxu0 }
  0xf9   :  { %v218_v33 = vadd.f32 %v320_v30, %v279_v29 }
  0xfb   :  { %v258_v34 = vadd.f32 %v257_v23, %v218_v33 }
  0xfd   :  { %v263_v35 = vmax.f32 %v258_v34, 0.0 }
  0xff   :  { %264 = vst [vmem:[#allocation2] sm:$0xff] %v263_v35 }
 0x100   :  { %370 = shalt.err (!%p367_p4)
}
 0x101   :  { %s371_s2 = scalar_lea.hbm %s484_s3, 128 }
 0x102   :  { %p372_p5 = scmp.ne.s32.totalorder %s484_s3, %s371_s2  ;;  %p375_p6 = scmp.lt.u32.totalorder %s371_s2, %s484_s3 }
 0x104   :  { %p377_p7 = pnand %p375_p6, %p372_p5 }
 0x106   :  { %380 = shalt.err (!%p377_p7)
}
 0x107   :  { %274 = dma.vmem_to_hbm [thread:$0]  %s272_s1, 128, %s484_s3, [#allocation3]  }
 0x108   :  { %381 = dma.done.wait [#allocation3], 128  }
 0x109   :  { %382 = vsyncadd [#allocation3], 4294967168 }
 0x10a   :  { %278 = vsyncpa [#allocation3], 1 }

</bundles_post_ra>
